<compile_context>
chip_gen: v5e
topology: v5e:2x2
jax: 0.10.0
libtpu: 0.0.40
codegen_flags: <defaults>
</compile_context>

<pallas_src>
import jax
import jax.numpy as jnp
from jax.experimental import pallas as pl
from jax.experimental.pallas import tpu as pltpu

EPS = 1e-5  # BatchNorm2d default eps
_VMEM_LIMIT = 32 * 1024 * 1024  # safe scoped-VMEM budget on v5e/v6e/v7x


def bn_conv_mish(x_nchw, weight_oihw, gamma, beta, *, stride=1, padding=1,
                 dilation=1, compute_dtype=jnp.bfloat16):
    """x_nchw: (N, Cin, H, W). weight_oihw: (Cout, Cin, kh, kw). Returns NCHW f32."""
    N, Cin, H, W = x_nchw.shape
    Cout, Cin_w, kh, kw = weight_oihw.shape
    assert Cin_w == Cin, "groups != 1 not supported"  # TODO(synk): grouped conv

    eff_kh = dilation * (kh - 1) + 1
    eff_kw = dilation * (kw - 1) + 1
    Ho = (H + 2 * padding - eff_kh) // stride + 1
    Wo = (W + 2 * padding - eff_kw) // stride + 1
    Hp, Wp = H + 2 * padding, W + 2 * padding
    HpWp = Hp * Wp
    KK = kh * kw
    Cpad = ((Cout + 127) // 128) * 128          # lane-dense channel dim
    # Flattened padded-frame length touched by the shifted matmuls.
    L = (Ho - 1) * stride * Wp + (Wo - 1) * stride + 1

    # ---------------- wrapper glue: layout prep only (no im2col) ----------------
    x = jnp.transpose(x_nchw, (0, 2, 3, 1))                                # NHWC
    x = jnp.pad(x, ((0, 0), (padding, padding), (padding, padding), (0, 0)))
    x_flat = x.reshape(N, HpWp, Cin).astype(compute_dtype)                 # read once

    w = jnp.transpose(weight_oihw, (2, 3, 1, 0)).reshape(KK, Cin, Cout)
    w = jnp.pad(w, ((0, 0), (0, 0), (0, Cpad - Cout))).astype(compute_dtype)

    # Validity mask over the padded frame (1.0 at real output positions).
    fidx = jnp.arange(L)
    fr = fidx // Wp
    fc = fidx % Wp
    valid = (fr % stride == 0) & (fc % stride == 0) & (fc // stride < Wo)
    mask = valid.astype(jnp.float32)[:, None]                              # (L, 1)

    inter_dtype = compute_dtype  # intermediate conv activations (bf16 on perf path)

    # ---------------- pass 1: conv (shifted matmuls) + fused BN stats -----------
    def conv_stats_kernel(x_ref, w_ref, m_ref, y_ref, stat_ref):
        # Conv as kh*kw shifted 2-D matmuls; accumulate in a local f32 value so
        # stats come straight out of the accumulator (no VMEM re-read) and the
        # output block is stored exactly once.
        acc = None
        for idx in range(KK):
            i, j = idx // kw, idx % kw
            k = dilation * (i * Wp + j)                     # static offset
            lhs = x_ref[0, k:k + L, :]                      # (L, Cin)
            t = jnp.dot(lhs, w_ref[idx],
                        preferred_element_type=jnp.float32)  # (L, Cpad) f32
            acc = t if acc is None else acc + t
        # Fused per-channel sum / sum-of-squares over valid output positions.
        ym = acc * m_ref[...]                               # mask frame garbage
        s1 = jnp.sum(ym, axis=0, keepdims=True)             # (1, Cpad)
        s2 = jnp.sum(ym * acc, axis=0, keepdims=True)       # (1, Cpad)
        stat_ref[0] = jnp.concatenate([s1, s2], axis=0)     # (2, Cpad)
        y_ref[0] = acc.astype(y_ref.dtype)

    y_frame, stats = pl.pallas_call(
        conv_stats_kernel,
        out_shape=(jax.ShapeDtypeStruct((N, L, Cpad), inter_dtype),
                   jax.ShapeDtypeStruct((N, 2, Cpad), jnp.float32)),
        grid=(N,),
        in_specs=[
            pl.BlockSpec((1, HpWp, Cin), lambda n: (n, 0, 0)),
            pl.BlockSpec((KK, Cin, Cpad), lambda n: (0, 0, 0)),
            pl.BlockSpec((L, 1), lambda n: (0, 0)),
        ],
        out_specs=(
            pl.BlockSpec((1, L, Cpad), lambda n: (n, 0, 0)),
            pl.BlockSpec((1, 2, Cpad), lambda n: (n, 0, 0)),
        ),
        compiler_params=pltpu.CompilerParams(
            dimension_semantics=("parallel",),
            vmem_limit_bytes=_VMEM_LIMIT),
    )(x_flat, w, mask)

    # ---------------- finalize BN stats (tiny, wrapper-side) --------------------
    count = jnp.float32(N * Ho * Wo)
    s1 = jnp.sum(stats[:, 0, :], axis=0)                    # (Cpad,)
    s2 = jnp.sum(stats[:, 1, :], axis=0)
    mean = s1 / count
    var = jnp.maximum(s2 / count - mean * mean, 0.0)        # biased var (training BN)
    g = jnp.pad(gamma.astype(jnp.float32), (0, Cpad - Cout), constant_values=1.0)
    b = jnp.pad(beta.astype(jnp.float32), (0, Cpad - Cout))
    inv = jax.lax.rsqrt(var + EPS)
    scale = g * inv
    shift = b - mean * g * inv
    sc_sh = jnp.stack([scale, shift], axis=0)               # (2, Cpad) f32

    # ---------------- pass 2: normalize + Mish (lane-dense stores) --------------
    def bn_mish_kernel(y_ref, ss_ref, o_ref):
        z = y_ref[0].astype(jnp.float32) * ss_ref[0:1, :] + ss_ref[1:2, :]
        # Mish via tanh(softplus(z)) = ((1+e^z)^2 - 1) / ((1+e^z)^2 + 1).
        e = jnp.exp(jnp.minimum(z, 20.0))                   # clamp avoids f32 overflow
        t = 1.0 + e
        t2 = t * t
        den = t2 + 1.0
        rcp = pl.reciprocal(den, approx=True)
        rcp = rcp * (2.0 - den * rcp)                       # one Newton step -> ~f32
        o_ref[0] = (z * (t2 - 1.0) * rcp).astype(o_ref.dtype)

    out_frame = pl.pallas_call(
        bn_mish_kernel,
        out_shape=jax.ShapeDtypeStruct((N, L, Cpad), jnp.float32),
        grid=(N,),
        in_specs=[
            pl.BlockSpec((1, L, Cpad), lambda n: (n, 0, 0)),
            pl.BlockSpec((2, Cpad), lambda n: (0, 0)),
        ],
        out_specs=pl.BlockSpec((1, L, Cpad), lambda n: (n, 0, 0)),
        compiler_params=pltpu.CompilerParams(
            dimension_semantics=("parallel",),
            vmem_limit_bytes=_VMEM_LIMIT),
    )(y_frame, sc_sh)

    # ---------------- carve the real (Ho, Wo, Cout) window out, back to NCHW ----
    rows = (Ho - 1) * stride + 1
    out_frame = jnp.pad(out_frame, ((0, 0), (0, rows * Wp - L), (0, 0)))
    out_nhwc = out_frame.reshape(N, rows, Wp, Cpad)
    out_nhwc = out_nhwc[:, ::stride, :(Wo - 1) * stride + 1:stride, :Cout]
    return jnp.transpose(out_nhwc, (0, 3, 1, 2))


def _reference(x_nchw, weight_oihw, gamma, beta, *, stride=1, padding=1):
    y = jax.lax.conv_general_dilated(
        x_nchw, weight_oihw, (stride, stride),
        [(padding, padding), (padding, padding)],
        dimension_numbers=("NCHW", "OIHW", "NCHW"))
    mean = y.mean(axis=(0, 2, 3), keepdims=True)
    var = ((y - mean) ** 2).mean(axis=(0, 2, 3), keepdims=True)
    bn = (y - mean) / jnp.sqrt(var + EPS)
    bn = bn * gamma.reshape(1, -1, 1, 1) + beta.reshape(1, -1, 1, 1)
    return bn * jnp.tanh(jax.nn.softplus(bn))


if __name__ == "__main__":
    key = jax.random.PRNGKey(0)
    k_x, k_w = jax.random.split(key)

    # Shapes consistent with BN_Conv_Mish(in=4, out=8, kernel=3, stride=1, padding=1)
    N, Cin, H, W = 2, 4, 16, 16
    Cout, kh, kw = 8, 3, 3

    x = jax.random.normal(k_x, (N, Cin, H, W), dtype=jnp.float32)
    weight = 0.1 * jax.random.normal(k_w, (Cout, Cin, kh, kw), dtype=jnp.float32)
    gamma = jnp.ones((Cout,), dtype=jnp.float32)   # BatchNorm2d affine defaults
    beta = jnp.zeros((Cout,), dtype=jnp.float32)

    ref = _reference(x, weight, gamma, beta, stride=1, padding=1)

    # Exact-semantics path: f32 MXU inputs and f32 intermediates.
    out_f32 = bn_conv_mish(x, weight, gamma, beta, stride=1, padding=1,
                           compute_dtype=jnp.float32)
    out_f32 = jax.block_until_ready(out_f32)
    assert out_f32.shape == (N, Cout, H, W)
    assert jnp.max(jnp.abs(out_f32 - ref)) < 1e-3

    # Performance path: bf16 MXU inputs + bf16 intermediates, f32 accum/stats.
    out_bf16 = bn_conv_mish(x, weight, gamma, beta, stride=1, padding=1,
                            compute_dtype=jnp.bfloat16)
    out_bf16 = jax.block_until_ready(out_bf16)
    assert out_bf16.shape == (N, Cout, H, W)
    assert jnp.max(jnp.abs(out_bf16 - ref)) < 5e-2

    print("KERNEL_OK")
</pallas_src>

<mosaic_0001>
module attributes {stable_mosaic.version = 11 : i64} {
  func.func @conv_stats_kernel(%arg0: i32, %arg1: memref<1x324x4xf32, #tpu.memory_space<vmem>>, %arg2: memref<9x4x128xf32, #tpu.memory_space<vmem>>, %arg3: memref<286x1xf32, #tpu.memory_space<vmem>>, %arg4: memref<1x286x128xf32, #tpu.memory_space<vmem>>, %arg5: memref<1x2x128xf32, #tpu.memory_space<vmem>>) attributes {dimension_semantics = [#tpu.dimension_semantics<parallel>], iteration_bounds = array<i64: 2>, scalar_prefetch = 0 : i64, scratch_operands = 0 : i64, tpu.core_type = #tpu.core_type<tc>, window_params = [{transform_indices = @transform_0, window_bounds = array<i64: 1, 324, 4>}, {pipeline_mode = #tpu.pipeline_mode<synchronous>, transform_indices = @transform_1, window_bounds = array<i64: 9, 4, 128>}, {pipeline_mode = #tpu.pipeline_mode<synchronous>, transform_indices = @transform_2, window_bounds = array<i64: 286, 1>}, {transform_indices = @transform_3, window_bounds = array<i64: 1, 286, 128>}, {transform_indices = @transform_4, window_bounds = array<i64: 1, 2, 128>}]} {
    %c0 = arith.constant 0 : index
    %c0_0 = arith.constant 0 : index
    %c0_1 = arith.constant 0 : index
    %0 = vector.load %arg1[%c0, %c0_0, %c0_1] : memref<1x324x4xf32, #tpu.memory_space<vmem>>, vector<1x286x4xf32>
    %1 = vector.shape_cast %0 : vector<1x286x4xf32> to vector<286x4xf32>
    %c0_2 = arith.constant 0 : index
    %c0_3 = arith.constant 0 : index
    %c0_4 = arith.constant 0 : index
    %2 = vector.load %arg2[%c0_2, %c0_3, %c0_4] : memref<9x4x128xf32, #tpu.memory_space<vmem>>, vector<1x4x128xf32>
    %3 = vector.shape_cast %2 : vector<1x4x128xf32> to vector<4x128xf32>
    %cst = arith.constant dense<0.000000e+00> : vector<286x128xf32>
    %4 = tpu.matmul %1, %3, %cst {dimension_numbers = #tpu.dot_dimension_numbers<[1], [0], [0], [1], [0, 0, 1, 1], [], []>} : vector<286x4xf32>, vector<4x128xf32>, vector<286x128xf32> -> vector<286x128xf32>
    %c0_5 = arith.constant 0 : index
    %c1 = arith.constant 1 : index
    %c0_6 = arith.constant 0 : index
    %5 = vector.load %arg1[%c0_5, %c1, %c0_6] : memref<1x324x4xf32, #tpu.memory_space<vmem>>, vector<1x286x4xf32>
    %6 = vector.shape_cast %5 : vector<1x286x4xf32> to vector<286x4xf32>
    %c1_7 = arith.constant 1 : index
    %c0_8 = arith.constant 0 : index
    %c0_9 = arith.constant 0 : index
    %7 = vector.load %arg2[%c1_7, %c0_8, %c0_9] : memref<9x4x128xf32, #tpu.memory_space<vmem>>, vector<1x4x128xf32>
    %8 = vector.shape_cast %7 : vector<1x4x128xf32> to vector<4x128xf32>
    %cst_10 = arith.constant dense<0.000000e+00> : vector<286x128xf32>
    %9 = tpu.matmul %6, %8, %cst_10 {dimension_numbers = #tpu.dot_dimension_numbers<[1], [0], [0], [1], [0, 0, 1, 1], [], []>} : vector<286x4xf32>, vector<4x128xf32>, vector<286x128xf32> -> vector<286x128xf32>
    %10 = arith.addf %4, %9 : vector<286x128xf32>
    %c0_11 = arith.constant 0 : index
    %c2 = arith.constant 2 : index
    %c0_12 = arith.constant 0 : index
    %11 = vector.load %arg1[%c0_11, %c2, %c0_12] : memref<1x324x4xf32, #tpu.memory_space<vmem>>, vector<1x286x4xf32>
    %12 = vector.shape_cast %11 : vector<1x286x4xf32> to vector<286x4xf32>
    %c2_13 = arith.constant 2 : index
    %c0_14 = arith.constant 0 : index
    %c0_15 = arith.constant 0 : index
    %13 = vector.load %arg2[%c2_13, %c0_14, %c0_15] : memref<9x4x128xf32, #tpu.memory_space<vmem>>, vector<1x4x128xf32>
    %14 = vector.shape_cast %13 : vector<1x4x128xf32> to vector<4x128xf32>
    %cst_16 = arith.constant dense<0.000000e+00> : vector<286x128xf32>
    %15 = tpu.matmul %12, %14, %cst_16 {dimension_numbers = #tpu.dot_dimension_numbers<[1], [0], [0], [1], [0, 0, 1, 1], [], []>} : vector<286x4xf32>, vector<4x128xf32>, vector<286x128xf32> -> vector<286x128xf32>
    %16 = arith.addf %10, %15 : vector<286x128xf32>
    %c0_17 = arith.constant 0 : index
    %c18 = arith.constant 18 : index
    %c0_18 = arith.constant 0 : index
    %17 = vector.load %arg1[%c0_17, %c18, %c0_18] : memref<1x324x4xf32, #tpu.memory_space<vmem>>, vector<1x286x4xf32>
    %18 = vector.shape_cast %17 : vector<1x286x4xf32> to vector<286x4xf32>
    %c3 = arith.constant 3 : index
    %c0_19 = arith.constant 0 : index
    %c0_20 = arith.constant 0 : index
    %19 = vector.load %arg2[%c3, %c0_19, %c0_20] : memref<9x4x128xf32, #tpu.memory_space<vmem>>, vector<1x4x128xf32>
    %20 = vector.shape_cast %19 : vector<1x4x128xf32> to vector<4x128xf32>
    %cst_21 = arith.constant dense<0.000000e+00> : vector<286x128xf32>
    %21 = tpu.matmul %18, %20, %cst_21 {dimension_numbers = #tpu.dot_dimension_numbers<[1], [0], [0], [1], [0, 0, 1, 1], [], []>} : vector<286x4xf32>, vector<4x128xf32>, vector<286x128xf32> -> vector<286x128xf32>
    %22 = arith.addf %16, %21 : vector<286x128xf32>
    %c0_22 = arith.constant 0 : index
    %c19 = arith.constant 19 : index
    %c0_23 = arith.constant 0 : index
    %23 = vector.load %arg1[%c0_22, %c19, %c0_23] : memref<1x324x4xf32, #tpu.memory_space<vmem>>, vector<1x286x4xf32>
    %24 = vector.shape_cast %23 : vector<1x286x4xf32> to vector<286x4xf32>
    %c4 = arith.constant 4 : index
    %c0_24 = arith.constant 0 : index
    %c0_25 = arith.constant 0 : index
    %25 = vector.load %arg2[%c4, %c0_24, %c0_25] : memref<9x4x128xf32, #tpu.memory_space<vmem>>, vector<1x4x128xf32>
    %26 = vector.shape_cast %25 : vector<1x4x128xf32> to vector<4x128xf32>
    %cst_26 = arith.constant dense<0.000000e+00> : vector<286x128xf32>
    %27 = tpu.matmul %24, %26, %cst_26 {dimension_numbers = #tpu.dot_dimension_numbers<[1], [0], [0], [1], [0, 0, 1, 1], [], []>} : vector<286x4xf32>, vector<4x128xf32>, vector<286x128xf32> -> vector<286x128xf32>
    %28 = arith.addf %22, %27 : vector<286x128xf32>
    %c0_27 = arith.constant 0 : index
    %c20 = arith.constant 20 : index
    %c0_28 = arith.constant 0 : index
    %29 = vector.load %arg1[%c0_27, %c20, %c0_28] : memref<1x324x4xf32, #tpu.memory_space<vmem>>, vector<1x286x4xf32>
    %30 = vector.shape_cast %29 : vector<1x286x4xf32> to vector<286x4xf32>
    %c5 = arith.constant 5 : index
    %c0_29 = arith.constant 0 : index
    %c0_30 = arith.constant 0 : index
    %31 = vector.load %arg2[%c5, %c0_29, %c0_30] : memref<9x4x128xf32, #tpu.memory_space<vmem>>, vector<1x4x128xf32>
    %32 = vector.shape_cast %31 : vector<1x4x128xf32> to vector<4x128xf32>
    %cst_31 = arith.constant dense<0.000000e+00> : vector<286x128xf32>
    %33 = tpu.matmul %30, %32, %cst_31 {dimension_numbers = #tpu.dot_dimension_numbers<[1], [0], [0], [1], [0, 0, 1, 1], [], []>} : vector<286x4xf32>, vector<4x128xf32>, vector<286x128xf32> -> vector<286x128xf32>
    %34 = arith.addf %28, %33 : vector<286x128xf32>
    %c0_32 = arith.constant 0 : index
    %c36 = arith.constant 36 : index
    %c0_33 = arith.constant 0 : index
    %35 = vector.load %arg1[%c0_32, %c36, %c0_33] : memref<1x324x4xf32, #tpu.memory_space<vmem>>, vector<1x286x4xf32>
    %36 = vector.shape_cast %35 : vector<1x286x4xf32> to vector<286x4xf32>
    %c6 = arith.constant 6 : index
    %c0_34 = arith.constant 0 : index
    %c0_35 = arith.constant 0 : index
    %37 = vector.load %arg2[%c6, %c0_34, %c0_35] : memref<9x4x128xf32, #tpu.memory_space<vmem>>, vector<1x4x128xf32>
    %38 = vector.shape_cast %37 : vector<1x4x128xf32> to vector<4x128xf32>
    %cst_36 = arith.constant dense<0.000000e+00> : vector<286x128xf32>
    %39 = tpu.matmul %36, %38, %cst_36 {dimension_numbers = #tpu.dot_dimension_numbers<[1], [0], [0], [1], [0, 0, 1, 1], [], []>} : vector<286x4xf32>, vector<4x128xf32>, vector<286x128xf32> -> vector<286x128xf32>
    %40 = arith.addf %34, %39 : vector<286x128xf32>
    %c0_37 = arith.constant 0 : index
    %c37 = arith.constant 37 : index
    %c0_38 = arith.constant 0 : index
    %41 = vector.load %arg1[%c0_37, %c37, %c0_38] : memref<1x324x4xf32, #tpu.memory_space<vmem>>, vector<1x286x4xf32>
    %42 = vector.shape_cast %41 : vector<1x286x4xf32> to vector<286x4xf32>
    %c7 = arith.constant 7 : index
    %c0_39 = arith.constant 0 : index
    %c0_40 = arith.constant 0 : index
    %43 = vector.load %arg2[%c7, %c0_39, %c0_40] : memref<9x4x128xf32, #tpu.memory_space<vmem>>, vector<1x4x128xf32>
    %44 = vector.shape_cast %43 : vector<1x4x128xf32> to vector<4x128xf32>
    %cst_41 = arith.constant dense<0.000000e+00> : vector<286x128xf32>
    %45 = tpu.matmul %42, %44, %cst_41 {dimension_numbers = #tpu.dot_dimension_numbers<[1], [0], [0], [1], [0, 0, 1, 1], [], []>} : vector<286x4xf32>, vector<4x128xf32>, vector<286x128xf32> -> vector<286x128xf32>
    %46 = arith.addf %40, %45 : vector<286x128xf32>
    %c0_42 = arith.constant 0 : index
    %c38 = arith.constant 38 : index
    %c0_43 = arith.constant 0 : index
    %47 = vector.load %arg1[%c0_42, %c38, %c0_43] : memref<1x324x4xf32, #tpu.memory_space<vmem>>, vector<1x286x4xf32>
    %48 = vector.shape_cast %47 : vector<1x286x4xf32> to vector<286x4xf32>
    %c8 = arith.constant 8 : index
    %c0_44 = arith.constant 0 : index
    %c0_45 = arith.constant 0 : index
    %49 = vector.load %arg2[%c8, %c0_44, %c0_45] : memref<9x4x128xf32, #tpu.memory_space<vmem>>, vector<1x4x128xf32>
    %50 = vector.shape_cast %49 : vector<1x4x128xf32> to vector<4x128xf32>
    %cst_46 = arith.constant dense<0.000000e+00> : vector<286x128xf32>
    %51 = tpu.matmul %48, %50, %cst_46 {dimension_numbers = #tpu.dot_dimension_numbers<[1], [0], [0], [1], [0, 0, 1, 1], [], []>} : vector<286x4xf32>, vector<4x128xf32>, vector<286x128xf32> -> vector<286x128xf32>
    %52 = arith.addf %46, %51 : vector<286x128xf32>
    %c0_47 = arith.constant 0 : index
    %c0_48 = arith.constant 0 : index
    %53 = vector.load %arg3[%c0_47, %c0_48] : memref<286x1xf32, #tpu.memory_space<vmem>>, vector<286x1xf32>
    %54 = vector.broadcast %53 : vector<286x1xf32> to vector<286x128xf32>
    %55 = arith.mulf %52, %54 : vector<286x128xf32>
    %cst_49 = arith.constant dense<0.000000e+00> : vector<128xf32>
    %56 = vector.multi_reduction <add>, %55, %cst_49 [0] : vector<286x128xf32> to vector<128xf32>
    %57 = vector.shape_cast %56 : vector<128xf32> to vector<1x128xf32>
    %58 = arith.mulf %55, %52 : vector<286x128xf32>
    %cst_50 = arith.constant dense<0.000000e+00> : vector<128xf32>
    %59 = vector.multi_reduction <add>, %58, %cst_50 [0] : vector<286x128xf32> to vector<128xf32>
    %60 = vector.shape_cast %59 : vector<128xf32> to vector<1x128xf32>
    %61 = tpu.concatenate %57, %60 in 0 : vector<1x128xf32>, vector<1x128xf32> -> vector<2x128xf32>
    %c0_51 = arith.constant 0 : index
    %c0_52 = arith.constant 0 : index
    %c0_53 = arith.constant 0 : index
    %62 = vector.load %arg5[%c0_51, %c0_52, %c0_53] : memref<1x2x128xf32, #tpu.memory_space<vmem>>, vector<1x2x128xf32>
    %63 = vector.shape_cast %62 : vector<1x2x128xf32> to vector<2x128xf32>
    %64 = vector.shape_cast %61 : vector<2x128xf32> to vector<1x2x128xf32>
    tpu.vector_store %arg5[%c0_51, %c0_52, %c0_53], %64 {strides = array<i32>} : memref<1x2x128xf32, #tpu.memory_space<vmem>>, vector<1x2x128xf32>,
    %c0_54 = arith.constant 0 : index
    %c0_55 = arith.constant 0 : index
    %c0_56 = arith.constant 0 : index
    %65 = vector.load %arg4[%c0_54, %c0_55, %c0_56] : memref<1x286x128xf32, #tpu.memory_space<vmem>>, vector<1x286x128xf32>
    %66 = vector.shape_cast %65 : vector<1x286x128xf32> to vector<286x128xf32>
    %67 = vector.shape_cast %52 : vector<286x128xf32> to vector<1x286x128xf32>
    tpu.vector_store %arg4[%c0_54, %c0_55, %c0_56], %67 {strides = array<i32>} : memref<1x286x128xf32, #tpu.memory_space<vmem>>, vector<1x286x128xf32>,
    return
  }
  func.func @transform_0(%arg0: i32) -> (i32, i32, i32) {
    %c0_i32 = arith.constant 0 : i32
    %c0_i32_0 = arith.constant 0 : i32
    %c0_i32_1 = arith.constant 0 : i32
    return %arg0, %c0_i32, %c0_i32_0 : i32, i32, i32
  }
  func.func @transform_1(%arg0: i32) -> (i32, i32, i32) {
    %c0_i32 = arith.constant 0 : i32
    %c0_i32_0 = arith.constant 0 : i32
    %c0_i32_1 = arith.constant 0 : i32
    %c0_i32_2 = arith.constant 0 : i32
    return %c0_i32, %c0_i32_0, %c0_i32_1 : i32, i32, i32
  }
  func.func @transform_2(%arg0: i32) -> (i32, i32) {
    %c0_i32 = arith.constant 0 : i32
    %c0_i32_0 = arith.constant 0 : i32
    %c0_i32_1 = arith.constant 0 : i32
    return %c0_i32, %c0_i32_0 : i32, i32
  }
  func.func @transform_3(%arg0: i32) -> (i32, i32, i32) {
    %c0_i32 = arith.constant 0 : i32
    %c0_i32_0 = arith.constant 0 : i32
    %c0_i32_1 = arith.constant 0 : i32
    return %arg0, %c0_i32, %c0_i32_0 : i32, i32, i32
  }
  func.func @transform_4(%arg0: i32) -> (i32, i32, i32) {
    %c0_i32 = arith.constant 0 : i32
    %c0_i32_0 = arith.constant 0 : i32
    %c0_i32_1 = arith.constant 0 : i32
    return %arg0, %c0_i32, %c0_i32_0 : i32, i32, i32
  }
}

</mosaic_0001>

<bundles_post_ra>
// kernel: tpu_custom_call.1
= control target key start
LH: loop header
LB: loop body
LE: loop exit
PB: predicated region body
PF: predicated region fallthrough
CT: control target
= control target key end

     0   :  { %10 = vsyncpa [#allocation3], 0  ;;  %s5031_s0 = inlined_call_operand.vmem [shape: f32[2,324,4], index: 0, kind: input, shape index: {}]   ;;  %s5032_s1 = inlined_call_operand.vmem [shape: f32[9,4,128], index: 1, kind: input, shape index: {}]   ;;  %s5033_s2 = inlined_call_operand.vmem [shape: f32[286,1], index: 2, kind: input, shape index: {}]   ;;  %s5034_s3 = inlined_call_operand.vmem [shape: f32[2,286,128], index: 3, kind: output, shape index: {0}]   ;;  %s5035_s4 = inlined_call_operand.hbm [shape: f32[2,2,128], index: 4, kind: output, shape index: {1}]  }
   0x1   :  { %12 = vsyncpa [#allocation3 + $0x1], 0  ;;  %s3938_s15 = smov 0   ;;  %s3940_s16 = smov 0  }
   0x2   :  { %s3942_s17 = smov 0   ;;  %s3944_s18 = smov 0  }
   0x3 LB: > { %s3959_s19 = sadd.s32 4294967295, %s3910_s18   ;;  %s3448_s20 = sadd.s32 4294967294, %s3910_s18   ;;  %s3910_s18 = sphi %s3944_s18, %s5041_s18   ;;  %s3906_s17 = sphi %s3942_s17, %s5040_s17   ;;  %s3902_s16 = sphi %s3940_s16, %s5039_s16   ;;  %s3898_s15 = sphi %s3938_s15, %s5038_s15  }
   0x4   : > { %s3963_s21 = sadd.s32 1, %s3910_s18   ;;  %s119_s22 = sadd.s32 1, %s3906_s17 }
   0x5   : > { %s116_s23 = ssub.s32 %s3910_s18, %s3963_s21  ;;  %p129_p0 = scmp.ne.s32.totalorder %s3906_s17, %s3902_s16 }
   0x6   : > { %p117_p1 = scmp.eq.s32.totalorder %s116_s23, 0  ;;  %p130_p2 = scmp.eq.s32.totalorder %s3959_s19, 1 }
   0x7   : > { %p135_p3 = scmp.ne.s32.totalorder %s3902_s16, %s3898_s15  ;;  %p136_p4 = scmp.eq.s32.totalorder %s3448_s20, 1 }
   0x8   : > { %s3974_s24 = scalar_select %p117_p1, %s3906_s17, %s119_s22  }
   0x9   : > { %p3976_p5 = por %p130_p2, %p129_p0  ;;  %p3980_p6 = por %p136_p4, %p135_p3 }
   0xa   : > { %p3451_p7 = scmp.ge.s32.totalorder %s3910_s18, 1  ;;  %p168_p8 = scmp.lt.s32.totalorder %s3910_s18, 3 }
   0xc   : > { %p169_p9 = pnand %p3451_p7, %p168_p8 }
   0xd   : > { %p199_p10 = scmp.lt.s32.totalorder (!%p169_p9), %s3959_s19, 1  ;;  %s3797_s8 = sshll.u32 (!%p169_p9), %s3959_s19, 1 }
   0xe   : > { %172 = sbr.rel (%p169_p9) target bundleno = 826 (0x33a), region = 32  ;;  %s3868_s29 = scalar_lea.hbm (!%p169_p9), %s5035_s4, 4 }
  0x13   : > { %v3455_v0 = vld [vmem:[%s5032_s1 + $0x4] sm:$0xf]  ;;  %vm393_vm0 = vcmask 1043456   ;;  %v3530_v1 = vld [vmem:[%s5032_s1 + $0x8] sm:$0xf]  ;;  %s4002_s9 = scalar_select %p199_p10, %s3959_s19, 1 }
  0x14   : > { %3800 = vmatpush.msk.msra.mxu1 %vm393_vm0, %v3455_v0  ;;  %3801 = vmatpush.msk.msra.mxu2 %vm393_vm0, %v3455_v0  ;;  %v3568_v2 = vld [vmem:[%s5032_s1 + $0xc] sm:$0xf]  ;;  %v245_v3 = vld [vmem:[%s5032_s1] sm:$0xf]  ;;  %v3606_v4 = vld [vmem:[%s5032_s1 + $0x10] sm:$0xf] }
  0x15   : > { %3802 = vmatpush.msk.msra.mxu3 %vm393_vm0, %v3455_v0  ;;  %s3803_s12 = smul.u32 328, %s4002_s9  ;;  %3456 = vmatpush.msk.msra.mxu0 %vm393_vm0, %v3455_v0  ;;  %vm284_vm1 = vcmask 31744   ;;  %v3682_v29 = vld [vmem:[%s5032_s1 + $0x18] sm:$0xf]  ;;  %v3720_v30 = vld [vmem:[%s5032_s1 + $0x1c] sm:$0xf] }
  0x16   : > { %3531 = vmatpush.msk.msrb.mxu2 %vm393_vm0, %v3530_v1  ;;  %3493 = vmatpush.msk.msrb.mxu1 %vm393_vm0, %v245_v3  ;;  %v3644_v31 = vld [vmem:[%s5032_s1 + $0x14] sm:$0xf]  ;;  %v3758_v36 = vld [vmem:[%s5032_s1 + $0x20] sm:$0xf]  ;;  %vm3214_vm2 = vcmask 1045504   ;;  %vm3301_vm3 = vcmask 1040384  }
  0x17   : > { %3569 = vmatpush.msk.msrb.mxu3 %vm393_vm0, %v3568_v2  ;;  %3607 = vmatpush.msk.msrb.mxu0 %vm393_vm0, %v3606_v4  ;;  %s4017_s20 = scalar_lea.vmem %s5031_s0, %s3803_s12  ;;  %s3804_s12 = smul.u32 288, %s4002_s9 }
  0x18   : > { %v255_v5 = vld [vmem:[%s4017_s20 + $0x49] sm:$0xff]  ;;  %v264_v6 = vld [vmem:[%s4017_s20 + $0x91] sm:$0xff]  ;;  %v273_v7 = vld [vmem:[%s4017_s20 + $0xd9] sm:$0xff] }
  0x19   : > { %3466 = vmatmul.msk.f32.vlgmr.msra.gmra.mxu1 %vm284_vm1, %v255_v5  ;;  %3475 = vmatmul.msk.f32.vlgmr.msra.gmra.mxu2 %vm284_vm1, %v264_v6  ;;  %v246_v8 = vld [vmem:[%s4017_s20 + $0x1] sm:$0xff]  ;;  %v256_v9 = vld [vmem:[%s4017_s20 + $0x51] sm:$0xff]  ;;  %v265_v10 = vld [vmem:[%s4017_s20 + $0x99] sm:$0xff]  ;;  %s4725_s27 = scalar_lea.vmem %s5034_s3, %s3804_s12  ;;  %s3359_s12 = scalar_lea.hbm %s5035_s4, %s3797_s8 }
  0x1a   : > { %3484 = vmatmul.msk.f32.vlgmr.msra.gmra.mxu3 %vm284_vm1, %v273_v7  ;;  %3457 = vmatmul.msk.f32.vlgmr.msra.gmra.mxu0 %vm284_vm1, %v246_v8  ;;  %v274_v11 = vld [vmem:[%s4017_s20 + $0xe1] sm:$0xff]  ;;  %v247_v12 = vld [vmem:[%s4017_s20 + $0x9] sm:$0xff]  ;;  %v257_v13 = vld [vmem:[%s4017_s20 + $0x59] sm:$0xff]  ;;  %s3363_s14 = sshll.u32 %s3359_s12, 4  ;;  %s3364_s14 = int_to_ptr.hbm [resolvable:$true] %s3363_s14 }
  0x1b   : > { %v266_v14 = vld [vmem:[%s4017_s20 + $0xa1] sm:$0xff]  ;;  %v275_v15 = vld [vmem:[%s4017_s20 + $0xe9] sm:$0xff]  ;;  %v248_v16 = vld [vmem:[%s4017_s20 + $0x11] sm:$0xff]  ;;  %3683 = vmatpush.msk.msra.mxu2 %vm393_vm0, %v3682_v29  ;;  %3721 = vmatpush.msk.msra.mxu3 %vm393_vm0, %v3720_v30  ;;  %s3862_s22 = sshra.s32 %s3364_s14, 4  ;;  %s3863_s22 = int_to_ptr.hbm [resolvable:$true] %s3862_s22 }
  0x1c   : > { %v258_v17 = vld [vmem:[%s4017_s20 + $0x61] sm:$0xff]  ;;  %v267_v18 = vld [vmem:[%s4017_s20 + $0xa9] sm:$0xff]  ;;  %v276_v19 = vld [vmem:[%s4017_s20 + $0xf1] sm:$0xff]  ;;  %3645 = vmatpush.msk.msra.mxu1 %vm393_vm0, %v3644_v31  ;;  %3759 = vmatpush.msk.msra.mxu0 %vm393_vm0, %v3758_v36  ;;  %s3864_s23 = scalar_lea.hbm %s3863_s22, 2  ;;  %p3869_p0 = scmp.lt.s32.totalorder %s3863_s22, %s5035_s4 }
  0x1d   : > { %v249_v20 = vld [vmem:[%s4017_s20 + $0x19] sm:$0xff]  ;;  %v259_v21 = vld [vmem:[%s4017_s20 + $0x69] sm:$0xff]  ;;  %v268_v22 = vld [vmem:[%s4017_s20 + $0xb1] sm:$0xff]  ;;  %p3865_p11 = scmp.ne.s32.totalorder %s3863_s22, %s3864_s23  ;;  %p3870_p1 = scmp.lt.s32.totalorder %s3868_s29, %s3864_s23 }
  0x1e   : > { %v277_v23 = vld [vmem:[%s4017_s20 + $0xf9] sm:$0xff]  ;;  %v250_v24 = vld [vmem:[%s4017_s20 + $0x21] sm:$0xff]  ;;  %v260_v25 = vld [vmem:[%s4017_s20 + $0x71] sm:$0xff] }
  0x1f   : > { %v269_v26 = vld [vmem:[%s4017_s20 + $0xb9] sm:$0xff]  ;;  %v278_v27 = vld [vmem:[%s4017_s20 + $0x101] sm:$0xff]  ;;  %v251_v28 = vld [vmem:[%s4017_s20 + $0x29] sm:$0xff]  ;;  %p3866_p12 = pnand %p3865_p11, %p3976_p5  ;;  %p3871_p2 = por %p3870_p1, %p3869_p0 }
  0x20   : > { %v261_v32 = vld [vmem:[%s4017_s20 + $0x79] sm:$0xff]  ;;  %v270_v33 = vld [vmem:[%s4017_s20 + $0xc1] sm:$0xff]  ;;  %v279_v34 = vld [vmem:[%s4017_s20 + $0x109] sm:$0xff] }
  0x21   : > { %3467 = vmatmul.msk.f32.gmra.mxu1 %vm284_vm1, %v256_v9  ;;  %3476 = vmatmul.msk.f32.gmra.mxu2 %vm284_vm1, %v265_v10  ;;  %v252_v35 = vld [vmem:[%s4017_s20 + $0x31] sm:$0xff]  ;;  %v262_v37 = vld [vmem:[%s4017_s20 + $0x81] sm:$0xff]  ;;  %v271_v38 = vld [vmem:[%s4017_s20 + $0xc9] sm:$0xff]  ;;  %p3867_p13 = pneg %p3866_p12 }
  0x22   : > { %3485 = vmatmul.msk.f32.gmra.mxu3 %vm284_vm1, %v274_v11  ;;  %3458 = vmatmul.msk.f32.gmra.mxu0 %vm284_vm1, %v247_v12  ;;  %v280_v39 = vld [vmem:[%s4017_s20 + $0x111] sm:$0xff]  ;;  %v253_v40 = vld [vmem:[%s4017_s20 + $0x39] sm:$0xff]  ;;  %v263_v41 = vld [vmem:[%s4017_s20 + $0x89] sm:$0xff] }
  0x23   : > { %v272_v42 = vld [vmem:[%s4017_s20 + $0xd1] sm:$0xff]  ;;  %v281_v43 = vld [vmem:[%s4017_s20 + $0x119] sm:$0x3f]  ;;  %v254_v44 = vld [vmem:[%s4017_s20 + $0x41] sm:$0xff]  ;;  %p3872_p3 = pnand %p3871_p2, %p3867_p13 }
  0x24   : > { %v209_v45 = vld [vmem:[%s4017_s20] sm:$0xff]  ;;  %v1068_v47 = vld [vmem:[%s4017_s20 + $0x12] sm:$0xff]  ;;  %v210_v49 = vld [vmem:[%s4017_s20 + $0x8] sm:$0xff] }
  0x25   : > { %v758_v46 = vld [vmem:[%s4017_s20 + $0x2] sm:$0xff]  ;;  %v1378_v48 = vld [vmem:[%s4017_s20 + $0x13] sm:$0xff]  ;;  %v759_v50 = vld [vmem:[%s4017_s20 + $0xa] sm:$0xff] }
  0x26   : > { %v1069_v51 = vld [vmem:[%s4017_s20 + $0x1a] sm:$0xff]  ;;  %v211_v53 = vld [vmem:[%s4017_s20 + $0x10] sm:$0xff]  ;;  %v1070_v54 = vld [vmem:[%s4017_s20 + $0x22] sm:$0xff] }
  0x27   : > { %v1379_v52 = vld [vmem:[%s4017_s20 + $0x1b] sm:$0xff]  ;;  %v1380_v55 = vld [vmem:[%s4017_s20 + $0x23] sm:$0xff]  ;;  %v1381_v58 = vld [vmem:[%s4017_s20 + $0x2b] sm:$0xff] }
  0x28   : > { %v212_v56 = vld [vmem:[%s4017_s20 + $0x18] sm:$0xff]  ;;  %v1071_v57 = vld [vmem:[%s4017_s20 + $0x2a] sm:$0xff]  ;;  %v213_v59 = vld [vmem:[%s4017_s20 + $0x20] sm:$0xff] }
  0x29   : > { %3468 = vmatmul.msk.f32.gmra.mxu1 %vm284_vm1, %v257_v13  ;;  %3477 = vmatmul.msk.f32.gmra.mxu2 %vm284_vm1, %v266_v14  ;;  %v1072_v60 = vld [vmem:[%s4017_s20 + $0x32] sm:$0xff]  ;;  %v214_v62 = vld [vmem:[%s4017_s20 + $0x28] sm:$0xff]  ;;  %v1073_v63 = vld [vmem:[%s4017_s20 + $0x3a] sm:$0xff] }
  0x2a   : > { %3486 = vmatmul.msk.f32.gmra.mxu3 %vm284_vm1, %v275_v15  ;;  %3459 = vmatmul.msk.f32.gmra.mxu0 %vm284_vm1, %v248_v16  ;;  %v1382_v61 = vld [vmem:[%s4017_s20 + $0x33] sm:$0xff]  ;;  %v1383_v0 = vld [vmem:[%s4017_s20 + $0x3b] sm:$0xff]  ;;  %v1384_v3 = vld [vmem:[%s4017_s20 + $0x43] sm:$0xff] }
  0x2b   : > { %v215_v1 = vld [vmem:[%s4017_s20 + $0x30] sm:$0xff]  ;;  %v1074_v2 = vld [vmem:[%s4017_s20 + $0x42] sm:$0xff]  ;;  %v216_v5 = vld [vmem:[%s4017_s20 + $0x38] sm:$0xff] }
  0x2c   : > { %v1075_v6 = vld [vmem:[%s4017_s20 + $0x4a] sm:$0xff]  ;;  %v217_v12 = vld [vmem:[%s4017_s20 + $0x40] sm:$0xff]  ;;  %v1076_v13 = vld [vmem:[%s4017_s20 + $0x52] sm:$0xff] }
  0x2d   : > { %v1385_v8 = vld [vmem:[%s4017_s20 + $0x4b] sm:$0xff]  ;;  %v1386_v15 = vld [vmem:[%s4017_s20 + $0x53] sm:$0xff]  ;;  %v1388_v29 = vld [vmem:[%s4017_s20 + $0x63] sm:$0xff] }
  0x2e   : > { %v1389_v36 = vld [vmem:[%s4017_s20 + $0x6b] sm:$0xff] }
  0x31   : > { %3469 = vmatmul.msk.f32.gmra.mxu1 %vm284_vm1, %v258_v17  ;;  %3478 = vmatmul.msk.f32.gmra.mxu2 %vm284_vm1, %v267_v18 }
  0x32   : > { %3487 = vmatmul.msk.f32.gmra.mxu3 %vm284_vm1, %v276_v19  ;;  %3460 = vmatmul.msk.f32.gmra.mxu0 %vm284_vm1, %v249_v20  ;;  %v218_v19 = vld [vmem:[%s4017_s20 + $0x48] sm:$0xff]  ;;  %v1077_v20 = vld [vmem:[%s4017_s20 + $0x5a] sm:$0xff] }
  0x39   : > { %3470 = vmatmul.msk.f32.gmra.mxu1 %vm284_vm1, %v259_v21  ;;  %3479 = vmatmul.msk.f32.gmra.mxu2 %vm284_vm1, %v268_v22  ;;  %v1387_v22 = vld [vmem:[%s4017_s20 + $0x5b] sm:$0xff] }
  0x3a   : > { %3488 = vmatmul.msk.f32.gmra.mxu3 %vm284_vm1, %v277_v23  ;;  %3461 = vmatmul.msk.f32.gmra.mxu0 %vm284_vm1, %v250_v24 }
  0x41   : > { %3471 = vmatmul.msk.f32.gmra.mxu1 %vm284_vm1, %v260_v25  ;;  %3480 = vmatmul.msk.f32.gmra.mxu2 %vm284_vm1, %v269_v26  ;;  %v219_v26 = vld [vmem:[%s4017_s20 + $0x50] sm:$0xff] }
  0x42   : > { %3489 = vmatmul.msk.f32.gmra.mxu3 %vm284_vm1, %v278_v27  ;;  %3462 = vmatmul.msk.f32.gmra.mxu0 %vm284_vm1, %v251_v28  ;;  %v1078_v27 = vld [vmem:[%s4017_s20 + $0x62] sm:$0xff] }
  0x49   : > { %3472 = vmatmul.msk.f32.gmra.mxu1 %vm284_vm1, %v261_v32  ;;  %3481 = vmatmul.msk.f32.gmra.mxu2 %vm284_vm1, %v270_v33  ;;  %v220_v33 = vld [vmem:[%s4017_s20 + $0x58] sm:$0xff] }
  0x4a   : > { %3490 = vmatmul.msk.f32.gmra.mxu3 %vm284_vm1, %v279_v34  ;;  %3463 = vmatmul.msk.f32.gmra.mxu0 %vm284_vm1, %v252_v35  ;;  %v1079_v34 = vld [vmem:[%s4017_s20 + $0x6a] sm:$0xff] }
  0x51   : > { %3473 = vmatmul.msk.f32.gmra.mxu1 %vm284_vm1, %v262_v37  ;;  %3482 = vmatmul.msk.f32.gmra.mxu2 %vm284_vm1, %v271_v38 }
  0x52   : > { %3491 = vmatmul.msk.f32.gmra.mxu3 %vm284_vm1, %v280_v39  ;;  %3464 = vmatmul.msk.f32.gmra.mxu0 %vm284_vm1, %v253_v40  ;;  %v221_v40 = vld [vmem:[%s4017_s20 + $0x60] sm:$0xff] }
  0x59   : > { %3474 = vmatmul.msk.f32.gmra.mxu1 %vm284_vm1, %v263_v41  ;;  %3483 = vmatmul.msk.f32.gmra.mxu2 %vm284_vm1, %v272_v42  ;;  %v1080_v41 = vld [vmem:[%s4017_s20 + $0x72] sm:$0xff] }
  0x5a   : > { %3492 = vmatmul.msk.f32.gmra.mxu3 %vm284_vm1, %v281_v43  ;;  %3465 = vmatmul.msk.f32.gmra.mxu0 %vm284_vm1, %v254_v44  ;;  %v1390_v43 = vld [vmem:[%s4017_s20 + $0x73] sm:$0xff] }
  0x61   : > { %3494 = vmatmul.msk.f32.vlgmr.msrb.gmra.mxu1 %vm284_vm1, %v209_v45  ;;  %3532 = vmatmul.msk.f32.vlgmr.msrb.gmra.mxu2 %vm284_vm1, %v758_v46 }
  0x62   : > { %3570 = vmatmul.msk.f32.vlgmr.msrb.gmra.mxu3 %vm284_vm1, %v1068_v47  ;;  %3608 = vmatmul.msk.f32.vlgmr.msrb.gmra.mxu0 %vm284_vm1, %v1378_v48  ;;  %v1081_v48 = vld [vmem:[%s4017_s20 + $0x7a] sm:$0xff] }
  0x69   : > { %3495 = vmatmul.msk.f32.gmra.mxu1 %vm284_vm1, %v210_v49  ;;  %3533 = vmatmul.msk.f32.gmra.mxu2 %vm284_vm1, %v759_v50  ;;  %v1391_v50 = vld [vmem:[%s4017_s20 + $0x7b] sm:$0xff] }
  0x6a   : > { %3571 = vmatmul.msk.f32.gmra.mxu3 %vm284_vm1, %v1069_v51  ;;  %3609 = vmatmul.msk.f32.gmra.mxu0 %vm284_vm1, %v1379_v52 }
  0x71   : > { %3496 = vmatmul.msk.f32.gmra.mxu1 %vm284_vm1, %v211_v53  ;;  %3534 = vmatmul.msk.f32.gmra.mxu2 %vm284_vm1, %v1068_v47  ;;  %v222_v47 = vld [vmem:[%s4017_s20 + $0x68] sm:$0xff] }
  0x72   : > { %3572 = vmatmul.msk.f32.gmra.mxu3 %vm284_vm1, %v1070_v54  ;;  %3610 = vmatmul.msk.f32.gmra.mxu0 %vm284_vm1, %v1380_v55  ;;  %v1082_v55 = vld [vmem:[%s4017_s20 + $0x82] sm:$0xff] }
  0x79   : > { %3497 = vmatmul.msk.f32.gmra.mxu1 %vm284_vm1, %v212_v56  ;;  %3535 = vmatmul.msk.f32.gmra.mxu2 %vm284_vm1, %v1069_v51 }
  0x7a   : > { %3573 = vmatmul.msk.f32.gmra.mxu3 %vm284_vm1, %v1071_v57  ;;  %3611 = vmatmul.msk.f32.gmra.mxu0 %vm284_vm1, %v1381_v58 }
  0x81   : > { %3498 = vmatmul.msk.f32.gmra.mxu1 %vm284_vm1, %v213_v59  ;;  %3536 = vmatmul.msk.f32.gmra.mxu2 %vm284_vm1, %v1070_v54  ;;  %v223_v54 = vld [vmem:[%s4017_s20 + $0x70] sm:$0xff] }
  0x82   : > { %3574 = vmatmul.msk.f32.gmra.mxu3 %vm284_vm1, %v1072_v60  ;;  %3612 = vmatmul.msk.f32.gmra.mxu0 %vm284_vm1, %v1382_v61  ;;  %v224_v61 = vld [vmem:[%s4017_s20 + $0x78] sm:$0xff] }
  0x89   : > { %3499 = vmatmul.msk.f32.gmra.mxu1 %vm284_vm1, %v214_v62  ;;  %3537 = vmatmul.msk.f32.gmra.mxu2 %vm284_vm1, %v1071_v57  ;;  %v1392_v57 = vld [vmem:[%s4017_s20 + $0x83] sm:$0xff] }
  0x8a   : > { %3575 = vmatmul.msk.f32.gmra.mxu3 %vm284_vm1, %v1073_v63  ;;  %3613 = vmatmul.msk.f32.gmra.mxu0 %vm284_vm1, %v1383_v0  ;;  %v1083_v62 = vld [vmem:[%s4017_s20 + $0x8a] sm:$0xff] }
  0x8b   : > { %v1393_v0 = vld [vmem:[%s4017_s20 + $0x8b] sm:$0xff] }
  0x91   : > { %3500 = vmatmul.msk.f32.gmra.mxu1 %vm284_vm1, %v215_v1  ;;  %3538 = vmatmul.msk.f32.gmra.mxu2 %vm284_vm1, %v1072_v60 }
  0x92   : > { %3576 = vmatmul.msk.f32.gmra.mxu3 %vm284_vm1, %v1074_v2  ;;  %3614 = vmatmul.msk.f32.gmra.mxu0 %vm284_vm1, %v1384_v3 }
  0x96   : > { %v4158_v4 = vpop.f32.mrf.mxu1 }
  0x97   : > { %v4162_v7 = vpop.f32.mrf.mxu0 }
  0x99   : > { %3501 = vmatmul.msk.f32.gmra.mxu1 %vm284_vm1, %v216_v5  ;;  %3539 = vmatmul.msk.f32.gmra.mxu2 %vm284_vm1, %v1073_v63  ;;  %v225_v5 = vld [vmem:[%s4017_s20 + $0x80] sm:$0xff] }
  0x9a   : > { %3577 = vmatmul.msk.f32.gmra.mxu3 %vm284_vm1, %v1075_v6  ;;  %3615 = vmatmul.msk.f32.gmra.mxu0 %vm284_vm1, %v1385_v8 }
  0x9c   : > { %v4169_v9 = vpop.f32.mrf.mxu2 }
  0x9d   : > { %v4171_v10 = vpop.f32.mrf.mxu3 }
  0x9e   : > { %v4173_v11 = vpop.f32.mrf.mxu1 }
  0x9f   : > { %v4177_v14 = vpop.f32.mrf.mxu0 }
  0xa1   : > { %3502 = vmatmul.msk.f32.gmra.mxu1 %vm284_vm1, %v217_v12  ;;  %3540 = vmatmul.msk.f32.gmra.mxu2 %vm284_vm1, %v1074_v2  ;;  %v1394_v12 = vld [vmem:[%s4017_s20 + $0x93] sm:$0xff] }
  0xa2   : > { %3578 = vmatmul.msk.f32.gmra.mxu3 %vm284_vm1, %v1076_v13  ;;  %3616 = vmatmul.msk.f32.gmra.mxu0 %vm284_vm1, %v1386_v15 }
  0xa4   : > { %v4184_v16 = vpop.f32.mrf.mxu2 }
  0xa5   : > { %v4186_v17 = vpop.f32.mrf.mxu3 }
  0xa6   : > { %v4188_v18 = vpop.f32.mrf.mxu1 }
  0xa7   : > { %v4192_v21 = vpop.f32.mrf.mxu0 }
  0xa9   : > { %3503 = vmatmul.msk.f32.gmra.mxu1 %vm284_vm1, %v218_v19  ;;  %3541 = vmatmul.msk.f32.gmra.mxu2 %vm284_vm1, %v1075_v6  ;;  %v1084_v6 = vld [vmem:[%s4017_s20 + $0x92] sm:$0xff] }
  0xaa   : > { %3579 = vmatmul.msk.f32.gmra.mxu3 %vm284_vm1, %v1077_v20  ;;  %3617 = vmatmul.msk.f32.gmra.mxu0 %vm284_vm1, %v1387_v22 }
  0xac   : > { %v4199_v23 = vpop.f32.mrf.mxu2 }
  0xad   : > { %v4201_v24 = vpop.f32.mrf.mxu3 }
  0xae   : > { %v4203_v25 = vpop.f32.mrf.mxu1 }
  0xaf   : > { %v4207_v28 = vpop.f32.mrf.mxu0 }
  0xb1   : > { %3504 = vmatmul.msk.f32.gmra.mxu1 %vm284_vm1, %v219_v26  ;;  %3542 = vmatmul.msk.f32.gmra.mxu2 %vm284_vm1, %v1076_v13  ;;  %v226_v26 = vld [vmem:[%s4017_s20 + $0x88] sm:$0xff] }
  0xb2   : > { %3580 = vmatmul.msk.f32.gmra.mxu3 %vm284_vm1, %v1078_v27  ;;  %3618 = vmatmul.msk.f32.gmra.mxu0 %vm284_vm1, %v1388_v29  ;;  %v1085_v29 = vld [vmem:[%s4017_s20 + $0x9a] sm:$0xff] }
  0xb4   : > { %v4214_v30 = vpop.f32.mrf.mxu2 }
  0xb5   : > { %v4216_v31 = vpop.f32.mrf.mxu3 }
  0xb6   : > { %v4218_v32 = vpop.f32.mrf.mxu1 }
  0xb7   : > { %v4222_v35 = vpop.f32.mrf.mxu0 }
  0xb9   : > { %3505 = vmatmul.msk.f32.gmra.mxu1 %vm284_vm1, %v220_v33  ;;  %3543 = vmatmul.msk.f32.gmra.mxu2 %vm284_vm1, %v1077_v20 }
  0xba   : > { %3581 = vmatmul.msk.f32.gmra.mxu3 %vm284_vm1, %v1079_v34  ;;  %3619 = vmatmul.msk.f32.gmra.mxu0 %vm284_vm1, %v1389_v36 }
  0xbc   : > { %v4229_v37 = vpop.f32.mrf.mxu2 }
  0xbd   : > { %v4231_v38 = vpop.f32.mrf.mxu3 }
  0xbe   : > { %v4233_v39 = vpop.f32.mrf.mxu1 }
  0xbf   : > { %v4237_v42 = vpop.f32.mrf.mxu0 }
  0xc1   : > { %3506 = vmatmul.msk.f32.gmra.mxu1 %vm284_vm1, %v221_v40  ;;  %3544 = vmatmul.msk.f32.gmra.mxu2 %vm284_vm1, %v1078_v27 }
  0xc2   : > { %3582 = vmatmul.msk.f32.gmra.mxu3 %vm284_vm1, %v1080_v41  ;;  %3620 = vmatmul.msk.f32.gmra.mxu0 %vm284_vm1, %v1390_v43 }
  0xc4   : > { %v4244_v44 = vpop.f32.mrf.mxu2 }
  0xc5   : > { %v4246_v45 = vpop.f32.mrf.mxu3 }
  0xc6   : > { %v4248_v46 = vpop.f32.mrf.mxu1 }
  0xc7   : > { %v4252_v49 = vpop.f32.mrf.mxu0 }
  0xc9   : > { %3507 = vmatmul.msk.f32.gmra.mxu1 %vm284_vm1, %v222_v47  ;;  %3545 = vmatmul.msk.f32.gmra.mxu2 %vm284_vm1, %v1079_v34  ;;  %v1395_v34 = vld [vmem:[%s4017_s20 + $0x9b] sm:$0xff] }
  0xca   : > { %3583 = vmatmul.msk.f32.gmra.mxu3 %vm284_vm1, %v1081_v48  ;;  %3621 = vmatmul.msk.f32.gmra.mxu0 %vm284_vm1, %v1391_v50 }
  0xcc   : > { %v4259_v51 = vpop.f32.mrf.mxu2 }
  0xcd   : > { %v4261_v52 = vpop.f32.mrf.mxu3 }
  0xce   : > { %v4263_v53 = vpop.f32.mrf.mxu1 }
  0xcf   : > { %v4267_v56 = vpop.f32.mrf.mxu0 }
  0xd1   : > { %3508 = vmatmul.msk.f32.gmra.mxu1 %vm284_vm1, %v223_v54  ;;  %3546 = vmatmul.msk.f32.gmra.mxu2 %vm284_vm1, %v1080_v41  ;;  %v1086_v54 = vld [vmem:[%s4017_s20 + $0xa2] sm:$0xff] }
  0xd2   : > { %3584 = vmatmul.msk.f32.gmra.mxu3 %vm284_vm1, %v1082_v55  ;;  %3622 = vmatmul.msk.f32.gmra.mxu0 %vm284_vm1, %v1392_v57  ;;  %v1396_v57 = vld [vmem:[%s4017_s20 + $0xa3] sm:$0xff] }
  0xd4   : > { %v4274_v58 = vpop.f32.mrf.mxu2 }
  0xd5   : > { %v4276_v59 = vpop.f32.mrf.mxu3 }
  0xd6   : > { %v4278_v60 = vpop.f32.mrf.mxu1 }
  0xd7   : > { %v4282_v63 = vpop.f32.mrf.mxu0 }
  0xd9   : > { %3509 = vmatmul.msk.f32.gmra.mxu1 %vm284_vm1, %v224_v61  ;;  %3547 = vmatmul.msk.f32.gmra.mxu2 %vm284_vm1, %v1081_v48  ;;  %v227_v48 = vld [vmem:[%s4017_s20 + $0x90] sm:$0xff] }
  0xda   : > { %3585 = vmatmul.msk.f32.gmra.mxu3 %vm284_vm1, %v1083_v62  ;;  %3623 = vmatmul.msk.f32.gmra.mxu0 %vm284_vm1, %v1393_v0 }
  0xdc   : > { %v4289_v1 = vpop.f32.mrf.mxu2 }
  0xdd   : > { %v4291_v2 = vpop.f32.mrf.mxu3 }
  0xde   : > { %v650_v3 = vpop.f32.mrf.mxu1 }
  0xdf   : > { %v1544_v8 = vpop.f32.mrf.mxu0  ;;  %v651_v13 = vadd.f32 %v650_v3, %v4162_v7 }
  0xe1   : > { %3510 = vmatmul.msk.f32.gmra.mxu1 %vm284_vm1, %v225_v5  ;;  %3548 = vmatmul.msk.f32.gmra.mxu2 %vm284_vm1, %v1082_v55 }
  0xe2   : > { %3586 = vmatmul.msk.f32.gmra.mxu3 %vm284_vm1, %v1084_v6  ;;  %3624 = vmatmul.msk.f32.gmra.mxu0 %vm284_vm1, %v1394_v12 }
  0xe4   : > { %v924_v15 = vpop.f32.mrf.mxu2 }
  0xe5   : > { %v1032_v19 = vadd.f32 %v924_v15, %v651_v13  ;;  %v1234_v20 = vpop.f32.mrf.mxu3  ;;  %v1087_v13 = vld [vmem:[%s4017_s20 + $0xaa] sm:$0xff] }
  0xe6   : > { %v653_v22 = vpop.f32.mrf.mxu1 }
  0xe7   : > { %v1342_v27 = vadd.f32 %v1234_v20, %v1032_v19  ;;  %v1547_v33 = vpop.f32.mrf.mxu0  ;;  %v654_v7 = vadd.f32 %v653_v22, %v4177_v14  ;;  %v1397_v19 = vld [vmem:[%s4017_s20 + $0xab] sm:$0xff] }
  0xe9   : > { %v4304_v36 = vadd.f32 %v1544_v8, %v1342_v27  ;;  %3511 = vmatmul.msk.f32.gmra.mxu1 %vm284_vm1, %v226_v26  ;;  %3549 = vmatmul.msk.f32.gmra.mxu2 %vm284_vm1, %v1083_v62  ;;  %v228_v8 = vld [vmem:[%s4017_s20 + $0x98] sm:$0xff] }
  0xea   : > { %3587 = vmatmul.msk.f32.gmra.mxu3 %vm284_vm1, %v1085_v29  ;;  %3625 = vmatmul.msk.f32.gmra.mxu0 %vm284_vm1, %v1395_v34 }
  0xec   : > { %v927_v40 = vpop.f32.mrf.mxu2 }
  0xed   : > { %v1033_v41 = vadd.f32 %v927_v40, %v654_v7  ;;  %v1237_v43 = vpop.f32.mrf.mxu3  ;;  %v1088_v7 = vld [vmem:[%s4017_s20 + $0xb2] sm:$0xff] }
  0xee   : > { %v656_v47 = vpop.f32.mrf.mxu1 }
  0xef   : > { %v1343_v50 = vadd.f32 %v1237_v43, %v1033_v41  ;;  %v1550_v55 = vpop.f32.mrf.mxu0  ;;  %v657_v14 = vadd.f32 %v656_v47, %v4192_v21  ;;  %v1398_v41 = vld [vmem:[%s4017_s20 + $0xb3] sm:$0xff] }
  0xf1   : > { %v4314_v61 = vadd.f32 %v1547_v33, %v1343_v50  ;;  %3512 = vmatmul.msk.f32.gmra.mxu1 %vm284_vm1, %v227_v48  ;;  %3550 = vmatmul.msk.f32.gmra.mxu2 %vm284_vm1, %v1084_v6  ;;  %v229_v33 = vld [vmem:[%s4017_s20 + $0xa0] sm:$0xff] }
  0xf2   : > { %3588 = vmatmul.msk.f32.gmra.mxu3 %vm284_vm1, %v1086_v54  ;;  %3626 = vmatmul.msk.f32.gmra.mxu0 %vm284_vm1, %v1396_v57 }
  0xf4   : > { %v930_v62 = vpop.f32.mrf.mxu2 }
  0xf5   : > { %v1034_v0 = vadd.f32 %v930_v62, %v657_v14  ;;  %v1240_v3 = vpop.f32.mrf.mxu3  ;;  %v1089_v14 = vld [vmem:[%s4017_s20 + $0xba] sm:$0xff] }
  0xf6   : > { %v659_v5 = vpop.f32.mrf.mxu1 }
  0xf7   : > { %v1344_v12 = vadd.f32 %v1240_v3, %v1034_v0  ;;  %v1553_v15 = vpop.f32.mrf.mxu0  ;;  %v660_v21 = vadd.f32 %v659_v5, %v4207_v28  ;;  %v1399_v0 = vld [vmem:[%s4017_s20 + $0xbb] sm:$0xff] }
  0xf9   : > { %v4324_v20 = vadd.f32 %v1550_v55, %v1344_v12  ;;  %3513 = vmatmul.msk.f32.gmra.mxu1 %vm284_vm1, %v228_v8  ;;  %3551 = vmatmul.msk.f32.gmra.mxu2 %vm284_vm1, %v1085_v29  ;;  %v230_v55 = vld [vmem:[%s4017_s20 + $0xa8] sm:$0xff] }
  0xfa   : > { %3589 = vmatmul.msk.f32.gmra.mxu3 %vm284_vm1, %v1087_v13  ;;  %3627 = vmatmul.msk.f32.gmra.mxu0 %vm284_vm1, %v1397_v19 }
  0xfc   : > { %v933_v6 = vpop.f32.mrf.mxu2 }
  0xfd   : > { %v1035_v22 = vadd.f32 %v933_v6, %v660_v21  ;;  %v1243_v26 = vpop.f32.mrf.mxu3  ;;  %v1090_v21 = vld [vmem:[%s4017_s20 + $0xc2] sm:$0xff] }
  0xfe   : > { %v662_v27 = vpop.f32.mrf.mxu1 }
  0xff   : > { %v1345_v34 = vadd.f32 %v1243_v26, %v1035_v22  ;;  %v1556_v40 = vpop.f32.mrf.mxu0  ;;  %v663_v28 = vadd.f32 %v662_v27, %v4222_v35  ;;  %v1400_v22 = vld [vmem:[%s4017_s20 + $0xc3] sm:$0xff] }
 0x101   : > { %v4334_v43 = vadd.f32 %v1553_v15, %v1345_v34  ;;  %3514 = vmatmul.msk.f32.gmra.mxu1 %vm284_vm1, %v229_v33  ;;  %3552 = vmatmul.msk.f32.gmra.mxu2 %vm284_vm1, %v1086_v54  ;;  %v231_v15 = vld [vmem:[%s4017_s20 + $0xb0] sm:$0xff] }
 0x102   : > { %3590 = vmatmul.msk.f32.gmra.mxu3 %vm284_vm1, %v1088_v7  ;;  %3628 = vmatmul.msk.f32.gmra.mxu0 %vm284_vm1, %v1398_v41 }
 0x104   : > { %v936_v29 = vpop.f32.mrf.mxu2 }
 0x105   : > { %v1036_v47 = vadd.f32 %v936_v29, %v663_v28  ;;  %v1246_v48 = vpop.f32.mrf.mxu3  ;;  %v1091_v28 = vld [vmem:[%s4017_s20 + $0xca] sm:$0xff] }
 0x106   : > { %v665_v50 = vpop.f32.mrf.mxu1 }
 0x107   : > { %v1346_v57 = vadd.f32 %v1246_v48, %v1036_v47  ;;  %v1559_v62 = vpop.f32.mrf.mxu0  ;;  %v666_v35 = vadd.f32 %v665_v50, %v4237_v42  ;;  %v1401_v47 = vld [vmem:[%s4017_s20 + $0xcb] sm:$0xff] }
 0x109   : > { %v4344_v3 = vadd.f32 %v1556_v40, %v1346_v57  ;;  %3515 = vmatmul.msk.f32.gmra.mxu1 %vm284_vm1, %v230_v55  ;;  %3553 = vmatmul.msk.f32.gmra.mxu2 %vm284_vm1, %v1087_v13  ;;  %v232_v40 = vld [vmem:[%s4017_s20 + $0xb8] sm:$0xff] }
 0x10a   : > { %3591 = vmatmul.msk.f32.gmra.mxu3 %vm284_vm1, %v1089_v14  ;;  %3629 = vmatmul.msk.f32.gmra.mxu0 %vm284_vm1, %v1399_v0 }
 0x10c   : > { %v939_v54 = vpop.f32.mrf.mxu2 }
 0x10d   : > { %v1037_v5 = vadd.f32 %v939_v54, %v666_v35  ;;  %v1249_v8 = vpop.f32.mrf.mxu3  ;;  %v1092_v35 = vld [vmem:[%s4017_s20 + $0xd2] sm:$0xff] }
 0x10e   : > { %v668_v12 = vpop.f32.mrf.mxu1 }
 0x10f   : > { %v1347_v19 = vadd.f32 %v1249_v8, %v1037_v5  ;;  %v1562_v6 = vpop.f32.mrf.mxu0  ;;  %v669_v42 = vadd.f32 %v668_v12, %v4252_v49  ;;  %v1402_v5 = vld [vmem:[%s4017_s20 + $0xd3] sm:$0xff] }
 0x111   : > { %v4354_v26 = vadd.f32 %v1559_v62, %v1347_v19  ;;  %3516 = vmatmul.msk.f32.gmra.mxu1 %vm284_vm1, %v231_v15  ;;  %3554 = vmatmul.msk.f32.gmra.mxu2 %vm284_vm1, %v1088_v7  ;;  %v233_v62 = vld [vmem:[%s4017_s20 + $0xc0] sm:$0xff] }
 0x112   : > { %3592 = vmatmul.msk.f32.gmra.mxu3 %vm284_vm1, %v1090_v21  ;;  %3630 = vmatmul.msk.f32.gmra.mxu0 %vm284_vm1, %v1400_v22 }
 0x114   : > { %v942_v13 = vpop.f32.mrf.mxu2 }
 0x115   : > { %v1038_v27 = vadd.f32 %v942_v13, %v669_v42  ;;  %v1252_v33 = vpop.f32.mrf.mxu3  ;;  %v1093_v42 = vld [vmem:[%s4017_s20 + $0xda] sm:$0xff] }
 0x116   : > { %v671_v34 = vpop.f32.mrf.mxu1 }
 0x117   : > { %v1348_v41 = vadd.f32 %v1252_v33, %v1038_v27  ;;  %v1565_v29 = vpop.f32.mrf.mxu0  ;;  %v672_v49 = vadd.f32 %v671_v34, %v4267_v56  ;;  %v1403_v27 = vld [vmem:[%s4017_s20 + $0xdb] sm:$0xff] }
 0x119   : > { %v4364_v48 = vadd.f32 %v1562_v6, %v1348_v41  ;;  %3517 = vmatmul.msk.f32.gmra.mxu1 %vm284_vm1, %v232_v40  ;;  %3555 = vmatmul.msk.f32.gmra.mxu2 %vm284_vm1, %v1089_v14  ;;  %v234_v6 = vld [vmem:[%s4017_s20 + $0xc8] sm:$0xff] }
 0x11a   : > { %3593 = vmatmul.msk.f32.gmra.mxu3 %vm284_vm1, %v1091_v28  ;;  %3631 = vmatmul.msk.f32.gmra.mxu0 %vm284_vm1, %v1401_v47 }
 0x11c   : > { %v945_v7 = vpop.f32.mrf.mxu2 }
 0x11d   : > { %v1039_v50 = vadd.f32 %v945_v7, %v672_v49  ;;  %v1255_v55 = vpop.f32.mrf.mxu3  ;;  %v1094_v49 = vld [vmem:[%s4017_s20 + $0xe2] sm:$0xff] }
 0x11e   : > { %v674_v57 = vpop.f32.mrf.mxu1 }
 0x11f   : > { %v1349_v0 = vadd.f32 %v1255_v55, %v1039_v50  ;;  %v1568_v54 = vpop.f32.mrf.mxu0  ;;  %v675_v56 = vadd.f32 %v674_v57, %v4282_v63  ;;  %v1404_v50 = vld [vmem:[%s4017_s20 + $0xe3] sm:$0xff] }
 0x121   : > { %v4374_v8 = vadd.f32 %v1565_v29, %v1349_v0  ;;  %3518 = vmatmul.msk.f32.gmra.mxu1 %vm284_vm1, %v233_v62  ;;  %3556 = vmatmul.msk.f32.gmra.mxu2 %vm284_vm1, %v1090_v21  ;;  %v235_v29 = vld [vmem:[%s4017_s20 + $0xd0] sm:$0xff] }
 0x122   : > { %3594 = vmatmul.msk.f32.gmra.mxu3 %vm284_vm1, %v1092_v35  ;;  %3632 = vmatmul.msk.f32.gmra.mxu0 %vm284_vm1, %v1402_v5 }
 0x124   : > { %v948_v14 = vpop.f32.mrf.mxu2 }
 0x125   : > { %v1040_v12 = vadd.f32 %v948_v14, %v675_v56  ;;  %v1258_v15 = vpop.f32.mrf.mxu3  ;;  %v1095_v56 = vld [vmem:[%s4017_s20 + $0xea] sm:$0xff] }
 0x126   : > { %v677_v19 = vpop.f32.mrf.mxu1 }
 0x127   : > { %v1350_v22 = vadd.f32 %v1258_v15, %v1040_v12  ;;  %v1571_v13 = vpop.f32.mrf.mxu0  ;;  %v678_v63 = vadd.f32 %v677_v19, %v4158_v4  ;;  %v1405_v12 = vld [vmem:[%s4017_s20 + $0xeb] sm:$0xff] }
 0x129   : > { %v4384_v33 = vadd.f32 %v1568_v54, %v1350_v22  ;;  %3519 = vmatmul.msk.f32.gmra.mxu1 %vm284_vm1, %v234_v6  ;;  %3557 = vmatmul.msk.f32.gmra.mxu2 %vm284_vm1, %v1091_v28  ;;  %v236_v54 = vld [vmem:[%s4017_s20 + $0xd8] sm:$0xff] }
 0x12a   : > { %3595 = vmatmul.msk.f32.gmra.mxu3 %vm284_vm1, %v1093_v42  ;;  %3633 = vmatmul.msk.f32.gmra.mxu0 %vm284_vm1, %v1403_v27 }
 0x12c   : > { %v951_v21 = vpop.f32.mrf.mxu2 }
 0x12d   : > { %v1041_v34 = vadd.f32 %v951_v21, %v678_v63  ;;  %v1261_v40 = vpop.f32.mrf.mxu3  ;;  %v1096_v63 = vld [vmem:[%s4017_s20 + $0xf2] sm:$0xff] }
 0x12e   : > { %v680_v41 = vpop.f32.mrf.mxu1 }
 0x12f   : > { %v1351_v47 = vadd.f32 %v1261_v40, %v1041_v34  ;;  %v1574_v7 = vpop.f32.mrf.mxu0  ;;  %v681_v4 = vadd.f32 %v680_v41, %v4173_v11  ;;  %v1406_v34 = vld [vmem:[%s4017_s20 + $0xf3] sm:$0xff] }
 0x131   : > { %v4394_v55 = vadd.f32 %v1571_v13, %v1351_v47  ;;  %3520 = vmatmul.msk.f32.gmra.mxu1 %vm284_vm1, %v235_v29  ;;  %3558 = vmatmul.msk.f32.gmra.mxu2 %vm284_vm1, %v1092_v35  ;;  %v237_v13 = vld [vmem:[%s4017_s20 + $0xe0] sm:$0xff] }
 0x132   : > { %3596 = vmatmul.msk.f32.gmra.mxu3 %vm284_vm1, %v1094_v49  ;;  %3634 = vmatmul.msk.f32.gmra.mxu0 %vm284_vm1, %v1404_v50 }
 0x134   : > { %v954_v28 = vpop.f32.mrf.mxu2 }
 0x135   : > { %v1042_v57 = vadd.f32 %v954_v28, %v681_v4  ;;  %v1264_v62 = vpop.f32.mrf.mxu3  ;;  %v1097_v4 = vld [vmem:[%s4017_s20 + $0xfa] sm:$0xff] }
 0x136   : > { %v683_v0 = vpop.f32.mrf.mxu1 }
 0x137   : > { %v1352_v5 = vadd.f32 %v1264_v62, %v1042_v57  ;;  %v1577_v14 = vpop.f32.mrf.mxu0  ;;  %v684_v11 = vadd.f32 %v683_v0, %v4188_v18  ;;  %v1407_v57 = vld [vmem:[%s4017_s20 + $0xfb] sm:$0xff] }
 0x139   : > { %v4404_v15 = vadd.f32 %v1574_v7, %v1352_v5  ;;  %3521 = vmatmul.msk.f32.gmra.mxu1 %vm284_vm1, %v236_v54  ;;  %3559 = vmatmul.msk.f32.gmra.mxu2 %vm284_vm1, %v1093_v42  ;;  %v238_v7 = vld [vmem:[%s4017_s20 + $0xe8] sm:$0xff] }
 0x13a   : > { %3597 = vmatmul.msk.f32.gmra.mxu3 %vm284_vm1, %v1095_v56  ;;  %3635 = vmatmul.msk.f32.gmra.mxu0 %vm284_vm1, %v1405_v12 }
 0x13c   : > { %v957_v35 = vpop.f32.mrf.mxu2 }
 0x13d   : > { %v1043_v19 = vadd.f32 %v957_v35, %v684_v11  ;;  %v1267_v6 = vpop.f32.mrf.mxu3  ;;  %v1098_v11 = vld [vmem:[%s4017_s20 + $0x102] sm:$0xff] }
 0x13e   : > { %v686_v22 = vpop.f32.mrf.mxu1 }
 0x13f   : > { %v1353_v27 = vadd.f32 %v1267_v6, %v1043_v19  ;;  %v1580_v21 = vpop.f32.mrf.mxu0  ;;  %v687_v18 = vadd.f32 %v686_v22, %v4203_v25  ;;  %v1408_v19 = vld [vmem:[%s4017_s20 + $0x103] sm:$0xff] }
 0x141   : > { %v4414_v40 = vadd.f32 %v1577_v14, %v1353_v27  ;;  %3522 = vmatmul.msk.f32.gmra.mxu1 %vm284_vm1, %v237_v13  ;;  %3560 = vmatmul.msk.f32.gmra.mxu2 %vm284_vm1, %v1094_v49  ;;  %v239_v14 = vld [vmem:[%s4017_s20 + $0xf0] sm:$0xff] }
 0x142   : > { %3598 = vmatmul.msk.f32.gmra.mxu3 %vm284_vm1, %v1096_v63  ;;  %3636 = vmatmul.msk.f32.gmra.mxu0 %vm284_vm1, %v1406_v34 }
 0x144   : > { %v960_v42 = vpop.f32.mrf.mxu2 }
 0x145   : > { %v1044_v41 = vadd.f32 %v960_v42, %v687_v18  ;;  %v1270_v29 = vpop.f32.mrf.mxu3  ;;  %v1099_v18 = vld [vmem:[%s4017_s20 + $0x10a] sm:$0xff] }
 0x146   : > { %v689_v47 = vpop.f32.mrf.mxu1 }
 0x147   : > { %v1354_v50 = vadd.f32 %v1270_v29, %v1044_v41  ;;  %v1583_v28 = vpop.f32.mrf.mxu0  ;;  %v690_v25 = vadd.f32 %v689_v47, %v4218_v32  ;;  %v1409_v41 = vld [vmem:[%s4017_s20 + $0x10b] sm:$0xff] }
 0x149   : > { %v4424_v62 = vadd.f32 %v1580_v21, %v1354_v50  ;;  %3523 = vmatmul.msk.f32.gmra.mxu1 %vm284_vm1, %v238_v7  ;;  %3561 = vmatmul.msk.f32.gmra.mxu2 %vm284_vm1, %v1095_v56  ;;  %v240_v21 = vld [vmem:[%s4017_s20 + $0xf8] sm:$0xff] }
 0x14a   : > { %3599 = vmatmul.msk.f32.gmra.mxu3 %vm284_vm1, %v1097_v4  ;;  %3637 = vmatmul.msk.f32.gmra.mxu0 %vm284_vm1, %v1407_v57 }
 0x14c   : > { %v963_v49 = vpop.f32.mrf.mxu2 }
 0x14d   : > { %v1045_v0 = vadd.f32 %v963_v49, %v690_v25  ;;  %v1273_v54 = vpop.f32.mrf.mxu3  ;;  %v1100_v25 = vld [vmem:[%s4017_s20 + $0x112] sm:$0xff] }
 0x14e   : > { %v692_v5 = vpop.f32.mrf.mxu1 }
 0x14f   : > { %v1355_v12 = vadd.f32 %v1273_v54, %v1045_v0  ;;  %v1586_v35 = vpop.f32.mrf.mxu0  ;;  %v693_v32 = vadd.f32 %v692_v5, %v4233_v39  ;;  %v1410_v0 = vld [vmem:[%s4017_s20 + $0x113] sm:$0xff] }
 0x151   : > { %v4434_v6 = vadd.f32 %v1583_v28, %v1355_v12  ;;  %3524 = vmatmul.msk.f32.gmra.mxu1 %vm284_vm1, %v239_v14  ;;  %3562 = vmatmul.msk.f32.gmra.mxu2 %vm284_vm1, %v1096_v63  ;;  %v241_v28 = vld [vmem:[%s4017_s20 + $0x100] sm:$0xff] }
 0x152   : > { %3600 = vmatmul.msk.f32.gmra.mxu3 %vm284_vm1, %v1098_v11  ;;  %3638 = vmatmul.msk.f32.gmra.mxu0 %vm284_vm1, %v1408_v19 }
 0x154   : > { %v966_v56 = vpop.f32.mrf.mxu2 }
 0x155   : > { %v1046_v22 = vadd.f32 %v966_v56, %v693_v32  ;;  %v1276_v13 = vpop.f32.mrf.mxu3  ;;  %v1101_v32 = vld [vmem:[%s4017_s20 + $0x11a] sm:$0xff] }
 0x156   : > { %v695_v27 = vpop.f32.mrf.mxu1 }
 0x157   : > { %v1356_v34 = vadd.f32 %v1276_v13, %v1046_v22  ;;  %v1589_v42 = vpop.f32.mrf.mxu0  ;;  %v696_v39 = vadd.f32 %v695_v27, %v4248_v46  ;;  %v1411_v22 = vld [vmem:[%s4017_s20 + $0x11b] sm:$0xff] }
 0x159   : > { %v4444_v29 = vadd.f32 %v1586_v35, %v1356_v34  ;;  %3525 = vmatmul.msk.f32.gmra.mxu1 %vm284_vm1, %v240_v21  ;;  %3563 = vmatmul.msk.f32.gmra.mxu2 %vm284_vm1, %v1097_v4  ;;  %v242_v35 = vld [vmem:[%s4017_s20 + $0x108] sm:$0xff] }
 0x15a   : > { %3601 = vmatmul.msk.f32.gmra.mxu3 %vm284_vm1, %v1099_v18  ;;  %3639 = vmatmul.msk.f32.gmra.mxu0 %vm284_vm1, %v1409_v41 }
 0x15c   : > { %v969_v63 = vpop.f32.mrf.mxu2 }
 0x15d   : > { %v1047_v47 = vadd.f32 %v969_v63, %v696_v39  ;;  %v1279_v7 = vpop.f32.mrf.mxu3  ;;  %v1102_v39 = vld [vmem:[%s4017_s20 + $0x122] sm:$0xff] }
 0x15e   : > { %v698_v50 = vpop.f32.mrf.mxu1 }
 0x15f   : > { %v1357_v57 = vadd.f32 %v1279_v7, %v1047_v47  ;;  %v1592_v49 = vpop.f32.mrf.mxu0  ;;  %v699_v46 = vadd.f32 %v698_v50, %v4263_v53  ;;  %v1412_v47 = vld [vmem:[%s4017_s20 + $0x123] sm:$0xff] }
 0x161   : > { %v4454_v54 = vadd.f32 %v1589_v42, %v1357_v57  ;;  %3526 = vmatmul.msk.f32.gmra.mxu1 %vm284_vm1, %v241_v28  ;;  %3564 = vmatmul.msk.f32.gmra.mxu2 %vm284_vm1, %v1098_v11  ;;  %v243_v42 = vld [vmem:[%s4017_s20 + $0x110] sm:$0xff] }
 0x162   : > { %3602 = vmatmul.msk.f32.gmra.mxu3 %vm284_vm1, %v1100_v25  ;;  %3640 = vmatmul.msk.f32.gmra.mxu0 %vm284_vm1, %v1410_v0  ;;  %v793_v0 = vld [vmem:[%s4017_s20 + $0x11a] sm:$0x3f] }
 0x164   : > { %v972_v4 = vpop.f32.mrf.mxu2 }
 0x165   : > { %v1048_v5 = vadd.f32 %v972_v4, %v699_v46  ;;  %v1282_v14 = vpop.f32.mrf.mxu3  ;;  %v1103_v4 = vld [vmem:[%s4017_s20 + $0x12a] sm:$0x3f] }
 0x166   : > { %v701_v12 = vpop.f32.mrf.mxu1 }
 0x167   : > { %v1358_v19 = vadd.f32 %v1282_v14, %v1048_v5  ;;  %v1595_v56 = vpop.f32.mrf.mxu0  ;;  %v702_v53 = vadd.f32 %v701_v12, %v4278_v60  ;;  %v1413_v14 = vld [vmem:[%s4017_s20 + $0x12b] sm:$0x3f]  ;;  %v3912_v12 = vmov 0  }
 0x168   : > { %3845 = vset.pattern.permute.xlu0 %v3912_v12  ;;  %3846 = vset.pattern.permute.xlu1 %v3912_v12 }
 0x169   : > { %v4464_v13 = vadd.f32 %v1592_v49, %v1358_v19  ;;  %3527 = vmatmul.msk.f32.gmra.mxu1 %vm284_vm1, %v242_v35  ;;  %3565 = vmatmul.msk.f32.gmra.mxu2 %vm284_vm1, %v1099_v18  ;;  %v244_v49 = vld [vmem:[%s4017_s20 + $0x118] sm:$0x3f] }
 0x16a   : > { %3603 = vmatmul.msk.f32.gmra.mxu3 %vm284_vm1, %v1101_v32  ;;  %3641 = vmatmul.msk.f32.gmra.mxu0 %vm284_vm1, %v1411_v22 }
 0x16b   : > { %3847 = vset.pattern.permute.xlu2 %v3912_v12 }
 0x16c   : > { %v975_v11 = vpop.f32.mrf.mxu2 }
 0x16d   : > { %v1049_v27 = vadd.f32 %v975_v11, %v702_v53  ;;  %v1285_v21 = vpop.f32.mrf.mxu3  ;;  %v1688_v53 = vld [vmem:[%s4017_s20 + $0x14] sm:$0xff]  ;;  %v1998_v11 = vld [vmem:[%s4017_s20 + $0x24] sm:$0xff] }
 0x16e   : > { %v704_v34 = vpop.f32.mrf.mxu1 }
 0x16f   : > { %v1359_v41 = vadd.f32 %v1285_v21, %v1049_v27  ;;  %v1598_v63 = vpop.f32.mrf.mxu0  ;;  %v705_v60 = vadd.f32 %v704_v34, %v4169_v9  ;;  %v2308_v21 = vld [vmem:[%s4017_s20 + $0x25] sm:$0xff] }
 0x171   : > { %v4474_v18 = vadd.f32 %v1595_v56, %v1359_v41  ;;  %3528 = vmatmul.msk.f32.gmra.mxu1 %vm284_vm1, %v243_v42  ;;  %3566 = vmatmul.msk.f32.gmra.mxu2 %vm284_vm1, %v1100_v25  ;;  %v2928_v25 = vld [vmem:[%s5033_s2] sm:$0xff]  ;;  %v2929_v41 = vld [vmem:[%s5033_s2 + $0x8] sm:$0xff] }
 0x172   : > { %3604 = vmatmul.msk.f32.gmra.mxu3 %vm284_vm1, %v1102_v39  ;;  %3642 = vmatmul.msk.f32.gmra.mxu0 %vm284_vm1, %v1412_v47  ;;  %v2618_v42 = vld [vmem:[%s4017_s20 + $0x26] sm:$0xff] }
 0x173   : > { %2966 = vperm.xlu0 %3845, %v2928_v25  }
 0x174   : > { %v978_v7 = vpop.f32.mrf.mxu2 }
 0x175   : > { %v1050_v50 = vadd.f32 %v978_v7, %v705_v60  ;;  %v1288_v28 = vpop.f32.mrf.mxu3 }
 0x176   : > { %v707_v57 = vpop.f32.mrf.mxu1 }
 0x177   : > { %v1360_v46 = vadd.f32 %v1288_v28, %v1050_v50  ;;  %v1601_v5 = vpop.f32.mrf.mxu0  ;;  %v708_v35 = vadd.f32 %v707_v57, %v4184_v16  ;;  %v1689_v50 = vld [vmem:[%s4017_s20 + $0x1c] sm:$0xff]  ;;  %v1999_v28 = vld [vmem:[%s4017_s20 + $0x2c] sm:$0xff] }
 0x179   : > { %v4488_v9 = vadd.f32 %v1598_v63, %v1360_v46  ;;  %3529 = vmatmul.msk.f32.gmra.mxu1 %vm284_vm1, %v244_v49  ;;  %3567 = vmatmul.msk.f32.gmra.mxu2 %vm284_vm1, %v793_v0  ;;  %v2309_v49 = vld [vmem:[%s4017_s20 + $0x2d] sm:$0xff] }
 0x17a   : > { %3605 = vmatmul.msk.f32.gmra.mxu3 %vm284_vm1, %v1103_v4  ;;  %3643 = vmatmul.msk.f32.gmra.mxu0 %vm284_vm1, %v1413_v14  ;;  %v2619_v46 = vld [vmem:[%s4017_s20 + $0x2e] sm:$0xff] }
 0x17b   : > { %2971 = vperm.xlu0 %3845, %v2929_v41   ;;  %v2930_v4 = vld [vmem:[%s5033_s2 + $0x10] sm:$0xff] }
 0x17c   : > { %v981_v19 = vpop.f32.mrf.mxu2  ;;  %2976 = vperm.xlu1 %3846, %v2930_v4   ;;  %v2002_v4 = vld [vmem:[%s4017_s20 + $0x44] sm:$0xff] }
 0x17d   : > { %v1051_v32 = vadd.f32 %v981_v19, %v708_v35  ;;  %v1291_v56 = vpop.f32.mrf.mxu3  ;;  %v2000_v19 = vld [vmem:[%s4017_s20 + $0x34] sm:$0xff] }
 0x17e   : > { %v710_v22 = vpop.f32.mrf.mxu1 }
 0x17f   : > { %v1361_v27 = vadd.f32 %v1291_v56, %v1051_v32  ;;  %v1604_v34 = vpop.f32.mrf.mxu0  ;;  %v711_v39 = vadd.f32 %v710_v22, %v4199_v23  ;;  %v2310_v56 = vld [vmem:[%s4017_s20 + $0x35] sm:$0xff] }
 0x181   : > { %v4502_v16 = vadd.f32 %v1601_v5, %v1361_v27  ;;  %3646 = vmatmul.msk.f32.vlgmr.msra.gmra.mxu1 %vm284_vm1, %v1688_v53  ;;  %3684 = vmatmul.msk.f32.vlgmr.msra.gmra.mxu2 %vm284_vm1, %v1998_v11  ;;  %v2620_v53 = vld [vmem:[%s4017_s20 + $0x36] sm:$0xff] }
 0x182   : > { %3722 = vmatmul.msk.f32.vlgmr.msra.gmra.mxu3 %vm284_vm1, %v2308_v21  ;;  %3760 = vmatmul.msk.f32.vlgmr.msra.gmra.mxu0 %vm284_vm1, %v2618_v42  ;;  %v2931_v27 = vld [vmem:[%s5033_s2 + $0x18] sm:$0xff] }
 0x184   : > { %v984_v63 = vpop.f32.mrf.mxu2  ;;  %2981 = vperm.xlu1 %3846, %v2931_v27  }
 0x185   : > { %v1052_v47 = vadd.f32 %v984_v63, %v711_v39  ;;  %v1294_v60 = vpop.f32.mrf.mxu3  ;;  %v2001_v63 = vld [vmem:[%s4017_s20 + $0x3c] sm:$0xff] }
 0x186   : > { %v713_v7 = vpop.f32.mrf.mxu1 }
 0x187   : > { %v1362_v57 = vadd.f32 %v1294_v60, %v1052_v47  ;;  %v1607_v0 = vpop.f32.mrf.mxu0  ;;  %v714_v23 = vadd.f32 %v713_v7, %v4214_v30  ;;  %v2311_v60 = vld [vmem:[%s4017_s20 + $0x3d] sm:$0xff] }
 0x189   : > { %v4516_v5 = vadd.f32 %v1604_v34, %v1362_v57  ;;  %3647 = vmatmul.msk.f32.gmra.mxu1 %vm284_vm1, %v1689_v50  ;;  %3685 = vmatmul.msk.f32.gmra.mxu2 %vm284_vm1, %v1999_v28 }
 0x18a   : > { %3723 = vmatmul.msk.f32.gmra.mxu3 %vm284_vm1, %v2309_v49  ;;  %3761 = vmatmul.msk.f32.gmra.mxu0 %vm284_vm1, %v2619_v46 }
 0x18c   : > { %v987_v14 = vpop.f32.mrf.mxu2 }
 0x18d   : > { %v1053_v12 = vadd.f32 %v987_v14, %v714_v23  ;;  %v1297_v25 = vpop.f32.mrf.mxu3  ;;  %v2312_v14 = vld [vmem:[%s4017_s20 + $0x45] sm:$0xff] }
 0x18e   : > { %v716_v35 = vpop.f32.mrf.mxu1 }
 0x18f   : > { %v1363_v32 = vadd.f32 %v1297_v25, %v1053_v12  ;;  %v1610_v22 = vpop.f32.mrf.mxu0  ;;  %v717_v30 = vadd.f32 %v716_v35, %v4229_v37 }
 0x191   : > { %v4529_v21 = vadd.f32 %v1607_v0, %v1363_v32  ;;  %3648 = vmatmul.msk.f32.gmra.mxu1 %vm284_vm1, %v1998_v11  ;;  %3686 = vmatmul.msk.f32.gmra.mxu2 %vm284_vm1, %v2000_v19  ;;  %v2621_v11 = vld [vmem:[%s4017_s20 + $0x3e] sm:$0xff] }
 0x192   : > { %3724 = vmatmul.msk.f32.gmra.mxu3 %vm284_vm1, %v2310_v56  ;;  %3762 = vmatmul.msk.f32.gmra.mxu0 %vm284_vm1, %v2620_v53  ;;  %v2003_v53 = vld [vmem:[%s4017_s20 + $0x4c] sm:$0xff] }
 0x194   : > { %v990_v34 = vpop.f32.mrf.mxu2 }
 0x195   : > { %v1054_v42 = vadd.f32 %v990_v34, %v717_v30  ;;  %v1300_v41 = vpop.f32.mrf.mxu3  ;;  %v2313_v30 = vld [vmem:[%s4017_s20 + $0x4d] sm:$0xff] }
 0x196   : > { %v719_v39 = vpop.f32.mrf.mxu1 }
 0x197   : > { %v1364_v47 = vadd.f32 %v1300_v41, %v1054_v42  ;;  %v1613_v7 = vpop.f32.mrf.mxu0  ;;  %v720_v37 = vadd.f32 %v719_v39, %v4244_v44  ;;  %v2623_v42 = vld [vmem:[%s4017_s20 + $0x4e] sm:$0xff] }
 0x199   : > { %v4539_v50 = vadd.f32 %v1610_v22, %v1364_v47  ;;  %3649 = vmatmul.msk.f32.gmra.mxu1 %vm284_vm1, %v1999_v28  ;;  %3687 = vmatmul.msk.f32.gmra.mxu2 %vm284_vm1, %v2001_v63  ;;  %v2622_v28 = vld [vmem:[%s4017_s20 + $0x46] sm:$0xff] }
 0x19a   : > { %3725 = vmatmul.msk.f32.gmra.mxu3 %vm284_vm1, %v2311_v60  ;;  %3763 = vmatmul.msk.f32.gmra.mxu0 %vm284_vm1, %v2621_v11  ;;  %v2004_v11 = vld [vmem:[%s4017_s20 + $0x54] sm:$0xff] }
 0x19c   : > { %v993_v57 = vpop.f32.mrf.mxu2 }
 0x19d   : > { %v1055_v49 = vadd.f32 %v993_v57, %v720_v37  ;;  %v1303_v0 = vpop.f32.mrf.mxu3  ;;  %v2314_v37 = vld [vmem:[%s4017_s20 + $0x55] sm:$0xff] }
 0x19e   : > { %v722_v46 = vpop.f32.mrf.mxu1 }
 0x19f   : > { %v1365_v23 = vadd.f32 %v1303_v0, %v1055_v49  ;;  %v1616_v12 = vpop.f32.mrf.mxu0  ;;  %v723_v44 = vadd.f32 %v722_v46, %v4259_v51  ;;  %v2624_v0 = vld [vmem:[%s4017_s20 + $0x56] sm:$0xff] }
 0x1a0   : > { %v2935_v46 = vld [vmem:[%s5033_s2 + $0x38] sm:$0xff] }
 0x1a1   : > { %v4549_v25 = vadd.f32 %v1613_v7, %v1365_v23  ;;  %3650 = vmatmul.msk.f32.gmra.mxu1 %vm284_vm1, %v2000_v19  ;;  %3688 = vmatmul.msk.f32.gmra.mxu2 %vm284_vm1, %v2002_v4  ;;  %v2934_v19 = vld [vmem:[%s5033_s2 + $0x30] sm:$0xff] }
 0x1a2   : > { %3726 = vmatmul.msk.f32.gmra.mxu3 %vm284_vm1, %v2312_v14  ;;  %3764 = vmatmul.msk.f32.gmra.mxu0 %vm284_vm1, %v2622_v28 }
 0x1a3   : > { %2996 = vperm.xlu0 %3845, %v2934_v19   ;;  %3001 = vperm.xlu1 %3846, %v2935_v46  }
 0x1a4   : > { %v996_v35 = vpop.f32.mrf.mxu2 }
 0x1a5   : > { %v1056_v32 = vadd.f32 %v996_v35, %v723_v44  ;;  %v1306_v56 = vpop.f32.mrf.mxu3  ;;  %v2005_v35 = vld [vmem:[%s4017_s20 + $0x5c] sm:$0xff] }
 0x1a6   : > { %v725_v22 = vpop.f32.mrf.mxu1 }
 0x1a7   : > { %v1366_v27 = vadd.f32 %v1306_v56, %v1056_v32  ;;  %v1619_v34 = vpop.f32.mrf.mxu0  ;;  %v726_v51 = vadd.f32 %v725_v22, %v4274_v58  ;;  %v2315_v56 = vld [vmem:[%s4017_s20 + $0x5d] sm:$0xff] }
 0x1a9   : > { %v4562_v41 = vadd.f32 %v1616_v12, %v1366_v27  ;;  %3651 = vmatmul.msk.f32.gmra.mxu1 %vm284_vm1, %v2001_v63  ;;  %3689 = vmatmul.msk.f32.gmra.mxu2 %vm284_vm1, %v2003_v53  ;;  %v2932_v63 = vld [vmem:[%s5033_s2 + $0x20] sm:$0xff] }
 0x1aa   : > { %3727 = vmatmul.msk.f32.gmra.mxu3 %vm284_vm1, %v2313_v30  ;;  %3765 = vmatmul.msk.f32.gmra.mxu0 %vm284_vm1, %v2623_v42  ;;  %v2625_v27 = vld [vmem:[%s4017_s20 + $0x5e] sm:$0xff] }
 0x1ab   : > { %2986 = vperm.xlu2 %3847, %v2932_v63  }
 0x1ac   : > { %v999_v39 = vpop.f32.mrf.mxu2 }
 0x1ad   : > { %v1057_v47 = vadd.f32 %v999_v39, %v726_v51  ;;  %v1309_v60 = vpop.f32.mrf.mxu3  ;;  %v2006_v39 = vld [vmem:[%s4017_s20 + $0x64] sm:$0xff] }
 0x1ae   : > { %v728_v7 = vpop.f32.mrf.mxu1 }
 0x1af   : > { %v1367_v57 = vadd.f32 %v1309_v60, %v1057_v47  ;;  %v1622_v49 = vpop.f32.mrf.mxu0  ;;  %v729_v23 = vadd.f32 %v728_v7, %v4289_v1  ;;  %v2316_v60 = vld [vmem:[%s4017_s20 + $0x65] sm:$0xff] }
 0x1b1   : > { %v4578_v58 = vadd.f32 %v1619_v34, %v1367_v57  ;;  %3652 = vmatmul.msk.f32.gmra.mxu1 %vm284_vm1, %v2002_v4  ;;  %3690 = vmatmul.msk.f32.gmra.mxu2 %vm284_vm1, %v2004_v11  ;;  %v2933_v4 = vld [vmem:[%s5033_s2 + $0x28] sm:$0xff] }
 0x1b2   : > { %3728 = vmatmul.msk.f32.gmra.mxu3 %vm284_vm1, %v2314_v37  ;;  %3766 = vmatmul.msk.f32.gmra.mxu0 %vm284_vm1, %v2624_v0  ;;  %v2626_v37 = vld [vmem:[%s4017_s20 + $0x66] sm:$0xff] }
 0x1b3   : > { %2991 = vperm.xlu2 %3847, %v2933_v4  }
 0x1b4   : > { %v1002_v14 = vpop.f32.mrf.mxu2 }
 0x1b5   : > { %v1058_v12 = vadd.f32 %v1002_v14, %v729_v23  ;;  %v1312_v28 = vpop.f32.mrf.mxu3  ;;  %v2007_v23 = vld [vmem:[%s4017_s20 + $0x6c] sm:$0xff] }
 0x1b6   : > { %v731_v44 = vpop.f32.mrf.mxu1 }
 0x1b7   : > { %v1368_v32 = vadd.f32 %v1312_v28, %v1058_v12  ;;  %v1625_v22 = vpop.f32.mrf.mxu0  ;;  %v732_v1 = vadd.f32 %v731_v44, %v4171_v10  ;;  %v2317_v12 = vld [vmem:[%s4017_s20 + $0x6d] sm:$0xff] }
 0x1b8   : > { %v2627_v44 = vld [vmem:[%s4017_s20 + $0x6e] sm:$0xff] }
 0x1b9   : > { %v4591_v30 = vadd.f32 %v1622_v49, %v1368_v32  ;;  %3653 = vmatmul.msk.f32.gmra.mxu1 %vm284_vm1, %v2003_v53  ;;  %3691 = vmatmul.msk.f32.gmra.mxu2 %vm284_vm1, %v2005_v35  ;;  %v2937_v53 = vld [vmem:[%s5033_s2 + $0x48] sm:$0xff] }
 0x1ba   : > { %3729 = vmatmul.msk.f32.gmra.mxu3 %vm284_vm1, %v2315_v56  ;;  %3767 = vmatmul.msk.f32.gmra.mxu0 %vm284_vm1, %v2625_v27 }
 0x1bb   : > { %3011 = vperm.xlu0 %3845, %v2937_v53  }
 0x1bc   : > { %v1005_v34 = vpop.f32.mrf.mxu2 }
 0x1bd   : > { %v1059_v42 = vadd.f32 %v1005_v34, %v732_v1  ;;  %v1315_v19 = vpop.f32.mrf.mxu3  ;;  %v2008_v1 = vld [vmem:[%s4017_s20 + $0x74] sm:$0xff] }
 0x1be   : > { %v734_v51 = vpop.f32.mrf.mxu1 }
 0x1bf   : > { %v1369_v47 = vadd.f32 %v1315_v19, %v1059_v42  ;;  %v1628_v7 = vpop.f32.mrf.mxu0  ;;  %v735_v10 = vadd.f32 %v734_v51, %v4186_v17  ;;  %v2318_v42 = vld [vmem:[%s4017_s20 + $0x75] sm:$0xff] }
 0x1c0   : > { %v2628_v51 = vld [vmem:[%s4017_s20 + $0x76] sm:$0xff] }
 0x1c1   : > { %v4604_v57 = vadd.f32 %v1625_v22, %v1369_v47  ;;  %3654 = vmatmul.msk.f32.gmra.mxu1 %vm284_vm1, %v2004_v11  ;;  %3692 = vmatmul.msk.f32.gmra.mxu2 %vm284_vm1, %v2006_v39  ;;  %v2938_v11 = vld [vmem:[%s5033_s2 + $0x50] sm:$0xff] }
 0x1c2   : > { %3730 = vmatmul.msk.f32.gmra.mxu3 %vm284_vm1, %v2316_v60  ;;  %3768 = vmatmul.msk.f32.gmra.mxu0 %vm284_vm1, %v2626_v37 }
 0x1c3   : > { %3016 = vperm.xlu1 %3846, %v2938_v11  }
 0x1c4   : > { %v1008_v49 = vpop.f32.mrf.mxu2 }
 0x1c5   : > { %v1060_v0 = vadd.f32 %v1008_v49, %v735_v10  ;;  %v1318_v63 = vpop.f32.mrf.mxu3  ;;  %v2009_v10 = vld [vmem:[%s4017_s20 + $0x7c] sm:$0xff] }
 0x1c6   : > { %v737_v46 = vpop.f32.mrf.mxu1 }
 0x1c7   : > { %v1370_v14 = vadd.f32 %v1318_v63, %v1060_v0  ;;  %v1631_v28 = vpop.f32.mrf.mxu0  ;;  %v738_v17 = vadd.f32 %v737_v46, %v4201_v24  ;;  %v2319_v0 = vld [vmem:[%s4017_s20 + $0x7d] sm:$0xff] }
 0x1c8   : > { %v2629_v46 = vld [vmem:[%s4017_s20 + $0x7e] sm:$0xff] }
 0x1c9   : > { %v4617_v32 = vadd.f32 %v1628_v7, %v1370_v14  ;;  %3655 = vmatmul.msk.f32.gmra.mxu1 %vm284_vm1, %v2005_v35  ;;  %3693 = vmatmul.msk.f32.gmra.mxu2 %vm284_vm1, %v2007_v23  ;;  %v2936_v35 = vld [vmem:[%s5033_s2 + $0x40] sm:$0xff] }
 0x1ca   : > { %3731 = vmatmul.msk.f32.gmra.mxu3 %vm284_vm1, %v2317_v12  ;;  %3769 = vmatmul.msk.f32.gmra.mxu0 %vm284_vm1, %v2627_v44 }
 0x1cb   : > { %3006 = vperm.xlu2 %3847, %v2936_v35  }
 0x1cc   : > { %v1011_v56 = vpop.f32.mrf.mxu2 }
 0x1cd   : > { %v1061_v22 = vadd.f32 %v1011_v56, %v738_v17  ;;  %v1321_v27 = vpop.f32.mrf.mxu3  ;;  %v2010_v17 = vld [vmem:[%s4017_s20 + $0x84] sm:$0xff] }
 0x1ce   : > { %v740_v4 = vpop.f32.mrf.mxu1 }
 0x1cf   : > { %v1371_v34 = vadd.f32 %v1321_v27, %v1061_v22  ;;  %v1634_v19 = vpop.f32.mrf.mxu0  ;;  %v741_v24 = vadd.f32 %v740_v4, %v4216_v31  ;;  %v2320_v22 = vld [vmem:[%s4017_s20 + $0x85] sm:$0xff] }
 0x1d0   : > { %v2630_v4 = vld [vmem:[%s4017_s20 + $0x86] sm:$0xff] }
 0x1d1   : > { %v4630_v47 = vadd.f32 %v1631_v28, %v1371_v34  ;;  %3656 = vmatmul.msk.f32.gmra.mxu1 %vm284_vm1, %v2006_v39  ;;  %3694 = vmatmul.msk.f32.gmra.mxu2 %vm284_vm1, %v2008_v1  ;;  %v2940_v39 = vld [vmem:[%s5033_s2 + $0x60] sm:$0xff] }
 0x1d2   : > { %3732 = vmatmul.msk.f32.gmra.mxu3 %vm284_vm1, %v2318_v42  ;;  %3770 = vmatmul.msk.f32.gmra.mxu0 %vm284_vm1, %v2628_v51 }
 0x1d3   : > { %3026 = vperm.xlu0 %3845, %v2940_v39  }
 0x1d4   : > { %v1014_v60 = vpop.f32.mrf.mxu2 }
 0x1d5   : > { %v1062_v7 = vadd.f32 %v1014_v60, %v741_v24  ;;  %v1324_v37 = vpop.f32.mrf.mxu3  ;;  %v2011_v24 = vld [vmem:[%s4017_s20 + $0x8c] sm:$0xff] }
 0x1d6   : > { %v743_v53 = vpop.f32.mrf.mxu1 }
 0x1d7   : > { %v1372_v49 = vadd.f32 %v1324_v37, %v1062_v7  ;;  %v1637_v63 = vpop.f32.mrf.mxu0  ;;  %v744_v31 = vadd.f32 %v743_v53, %v4231_v38  ;;  %v2321_v7 = vld [vmem:[%s4017_s20 + $0x8d] sm:$0xff] }
 0x1d8   : > { %v2631_v53 = vld [vmem:[%s4017_s20 + $0x8e] sm:$0xff] }
 0x1d9   : > { %v4643_v14 = vadd.f32 %v1634_v19, %v1372_v49  ;;  %3657 = vmatmul.msk.f32.gmra.mxu1 %vm284_vm1, %v2007_v23  ;;  %3695 = vmatmul.msk.f32.gmra.mxu2 %vm284_vm1, %v2009_v10  ;;  %v2941_v23 = vld [vmem:[%s5033_s2 + $0x68] sm:$0xff] }
 0x1da   : > { %3733 = vmatmul.msk.f32.gmra.mxu3 %vm284_vm1, %v2319_v0  ;;  %3771 = vmatmul.msk.f32.gmra.mxu0 %vm284_vm1, %v2629_v46 }
 0x1db   : > { %3031 = vperm.xlu1 %3846, %v2941_v23  }
 0x1dc   : > { %v1017_v12 = vpop.f32.mrf.mxu2 }
 0x1dd   : > { %v1063_v28 = vadd.f32 %v1017_v12, %v744_v31  ;;  %v1327_v44 = vpop.f32.mrf.mxu3  ;;  %v2012_v31 = vld [vmem:[%s4017_s20 + $0x94] sm:$0xff] }
 0x1de   : > { %v746_v11 = vpop.f32.mrf.mxu1 }
 0x1df   : > { %v1373_v56 = vadd.f32 %v1327_v44, %v1063_v28  ;;  %v1640_v27 = vpop.f32.mrf.mxu0  ;;  %v747_v38 = vadd.f32 %v746_v11, %v4246_v45  ;;  %v2322_v28 = vld [vmem:[%s4017_s20 + $0x95] sm:$0xff] }
 0x1e0   : > { %v2632_v11 = vld [vmem:[%s4017_s20 + $0x96] sm:$0xff] }
 0x1e1   : > { %v4656_v34 = vadd.f32 %v1637_v63, %v1373_v56  ;;  %3658 = vmatmul.msk.f32.gmra.mxu1 %vm284_vm1, %v2008_v1  ;;  %3696 = vmatmul.msk.f32.gmra.mxu2 %vm284_vm1, %v2010_v17  ;;  %v2939_v1 = vld [vmem:[%s5033_s2 + $0x58] sm:$0xff] }
 0x1e2   : > { %3734 = vmatmul.msk.f32.gmra.mxu3 %vm284_vm1, %v2320_v22  ;;  %3772 = vmatmul.msk.f32.gmra.mxu0 %vm284_vm1, %v2630_v4 }
 0x1e3   : > { %3021 = vperm.xlu2 %3847, %v2939_v1  }
 0x1e4   : > { %v1020_v42 = vpop.f32.mrf.mxu2 }
 0x1e5   : > { %v1064_v19 = vadd.f32 %v1020_v42, %v747_v38  ;;  %v1330_v51 = vpop.f32.mrf.mxu3  ;;  %v2013_v38 = vld [vmem:[%s4017_s20 + $0x9c] sm:$0xff] }
 0x1e6   : > { %v749_v35 = vpop.f32.mrf.mxu1 }
 0x1e7   : > { %v1374_v60 = vadd.f32 %v1330_v51, %v1064_v19  ;;  %v1643_v37 = vpop.f32.mrf.mxu0  ;;  %v750_v45 = vadd.f32 %v749_v35, %v4261_v52  ;;  %v2323_v19 = vld [vmem:[%s4017_s20 + $0x9d] sm:$0xff] }
 0x1e8   : > { %v2633_v35 = vld [vmem:[%s4017_s20 + $0x9e] sm:$0xff] }
 0x1e9   : > { %v4669_v49 = vadd.f32 %v1640_v27, %v1374_v60  ;;  %3659 = vmatmul.msk.f32.gmra.mxu1 %vm284_vm1, %v2009_v10  ;;  %3697 = vmatmul.msk.f32.gmra.mxu2 %vm284_vm1, %v2011_v24  ;;  %v2943_v10 = vld [vmem:[%s5033_s2 + $0x78] sm:$0xff] }
 0x1ea   : > { %3735 = vmatmul.msk.f32.gmra.mxu3 %vm284_vm1, %v2321_v7  ;;  %3773 = vmatmul.msk.f32.gmra.mxu0 %vm284_vm1, %v2631_v53 }
 0x1eb   : > { %3041 = vperm.xlu0 %3845, %v2943_v10  }
 0x1ec   : > { %v1023_v0 = vpop.f32.mrf.mxu2 }
 0x1ed   : > { %v1065_v63 = vadd.f32 %v1023_v0, %v750_v45  ;;  %v1333_v46 = vpop.f32.mrf.mxu3  ;;  %v2014_v45 = vld [vmem:[%s4017_s20 + $0xa4] sm:$0xff] }
 0x1ee   : > { %v752_v39 = vpop.f32.mrf.mxu1 }
 0x1ef   : > { %v1375_v12 = vadd.f32 %v1333_v46, %v1065_v63  ;;  %v1646_v44 = vpop.f32.mrf.mxu0  ;;  %v753_v52 = vadd.f32 %v752_v39, %v4276_v59  ;;  %v2324_v63 = vld [vmem:[%s4017_s20 + $0xa5] sm:$0xff] }
 0x1f0   : > { %v2634_v39 = vld [vmem:[%s4017_s20 + $0xa6] sm:$0xff] }
 0x1f1   : > { %v4682_v56 = vadd.f32 %v1643_v37, %v1375_v12  ;;  %3660 = vmatmul.msk.f32.gmra.mxu1 %vm284_vm1, %v2010_v17  ;;  %3698 = vmatmul.msk.f32.gmra.mxu2 %vm284_vm1, %v2012_v31  ;;  %v2944_v17 = vld [vmem:[%s5033_s2 + $0x80] sm:$0xff] }
 0x1f2   : > { %3736 = vmatmul.msk.f32.gmra.mxu3 %vm284_vm1, %v2322_v28  ;;  %3774 = vmatmul.msk.f32.gmra.mxu0 %vm284_vm1, %v2632_v11 }
 0x1f3   : > { %3046 = vperm.xlu1 %3846, %v2944_v17  }
 0x1f4   : > { %v1026_v22 = vpop.f32.mrf.mxu2 }
 0x1f5   : > { %v1066_v27 = vadd.f32 %v1026_v22, %v753_v52  ;;  %v1336_v4 = vpop.f32.mrf.mxu3  ;;  %v2015_v52 = vld [vmem:[%s4017_s20 + $0xac] sm:$0xff]  ;;  %v2967_v22 = vpop.permute.xlu0 %2966 }
 0x1f6   : > { %v755_v23 = vpop.f32.mrf.mxu1 }
 0x1f7   : > { %v1376_v42 = vadd.f32 %v1336_v4, %v1066_v27  ;;  %v1649_v51 = vpop.f32.mrf.mxu0  ;;  %v756_v59 = vadd.f32 %v755_v23, %v4291_v2  ;;  %v2325_v4 = vld [vmem:[%s4017_s20 + $0xad] sm:$0xff] }
 0x1f9   : > { %v4695_v60 = vadd.f32 %v1646_v44, %v1376_v42  ;;  %3661 = vmatmul.msk.f32.gmra.mxu1 %vm284_vm1, %v2011_v24  ;;  %3699 = vmatmul.msk.f32.gmra.mxu2 %vm284_vm1, %v2013_v38  ;;  %v2942_v24 = vld [vmem:[%s5033_s2 + $0x70] sm:$0xff] }
 0x1fa   : > { %3737 = vmatmul.msk.f32.gmra.mxu3 %vm284_vm1, %v2323_v19  ;;  %3775 = vmatmul.msk.f32.gmra.mxu0 %vm284_vm1, %v2633_v35  ;;  %v2946_v42 = vld [vmem:[%s5033_s2 + $0x90] sm:$0xff] }
 0x1fb   : > { %3036 = vperm.xlu2 %3847, %v2942_v24   ;;  %3056 = vperm.xlu0 %3845, %v2946_v42  }
 0x1fc   : > { %v1029_v7 = vpop.f32.mrf.mxu2 }
 0x1fd   : > { %v1067_v37 = vadd.f32 %v1029_v7, %v756_v59  ;;  %v1339_v53 = vpop.f32.mrf.mxu3  ;;  %v4734_v7 = vld [vmem:[%s4017_s20 + $0xb4] sm:$0xff] }
 0x1fe   : > { %v1854_v1 = vpop.f32.mrf.mxu1 }
 0x1ff   : > { %v1377_v0 = vadd.f32 %v1339_v53, %v1067_v37  ;;  %v2784_v46 = vpop.f32.mrf.mxu0  ;;  %v1962_v2 = vadd.f32 %v1854_v1, %v4304_v36  ;;  %v2326_v53 = vld [vmem:[%s4017_s20 + $0xb5] sm:$0xff] }
 0x201   : > { %v4708_v12 = vadd.f32 %v1649_v51, %v1377_v0  ;;  %3662 = vmatmul.msk.f32.gmra.mxu1 %vm284_vm1, %v2012_v31  ;;  %3700 = vmatmul.msk.f32.gmra.mxu2 %vm284_vm1, %v2014_v45  ;;  %v2635_v31 = vld [vmem:[%s4017_s20 + $0xae] sm:$0xff]  ;;  %v2636_v0 = vld [vmem:[%s4017_s20 + $0xb6] sm:$0xff] }
 0x202   : > { %3738 = vmatmul.msk.f32.gmra.mxu3 %vm284_vm1, %v2324_v63  ;;  %3776 = vmatmul.msk.f32.gmra.mxu0 %vm284_vm1, %v2634_v39  ;;  %v2972_v63 = vpop.permute.xlu0 %2971 }
 0x204   : > { %v2164_v28 = vpop.f32.mrf.mxu2 }
 0x205   : > { %v2272_v44 = vadd.f32 %v2164_v28, %v1962_v2  ;;  %v2474_v11 = vpop.f32.mrf.mxu3  ;;  %v2949_v28 = vld [vmem:[%s5033_s2 + $0xa8] sm:$0xff] }
 0x206   : > { %v1857_v10 = vpop.f32.mrf.mxu1  ;;  %3071 = vperm.xlu0 %3845, %v2949_v28  }
 0x207   : > { %v2582_v27 = vadd.f32 %v2474_v11, %v2272_v44  ;;  %v2787_v23 = vpop.f32.mrf.mxu0  ;;  %v1963_v19 = vadd.f32 %v1857_v10, %v4314_v61 }
 0x209   : > { %v2892_v36 = vadd.f32 %v2784_v46, %v2582_v27  ;;  %3663 = vmatmul.msk.f32.gmra.mxu1 %vm284_vm1, %v2013_v38  ;;  %3701 = vmatmul.msk.f32.gmra.mxu2 %vm284_vm1, %v2015_v52  ;;  %v2947_v38 = vld [vmem:[%s5033_s2 + $0x98] sm:$0xff] }
 0x20a   : > { %3739 = vmatmul.msk.f32.gmra.mxu3 %vm284_vm1, %v2325_v4  ;;  %3777 = vmatmul.msk.f32.gmra.mxu0 %vm284_vm1, %v2635_v31  ;;  %v4752_v4 = vld [vmem:[%s4017_s20 + $0xbc] sm:$0xff] }
 0x20b   : > { %3304 = vst [vmem:[%s4725_s27] sm:$0xff] %v2892_v36  ;;  %3061 = vperm.xlu1 %3846, %v2947_v38   ;;  %v3144_v46 = vmul.f32 %v2967_v22, %v2892_v36 }
 0x20c   : > { %v2167_v51 = vpop.f32.mrf.mxu2 }
 0x20d   : > { %v2273_v35 = vadd.f32 %v2167_v51, %v1963_v19  ;;  %v2477_v17 = vpop.f32.mrf.mxu3  ;;  %v2327_v19 = vld [vmem:[%s4017_s20 + $0xbd] sm:$0xff] }
 0x20e   : > { %v1860_v59 = vpop.f32.mrf.mxu1 }
 0x20f   : > { %v2583_v37 = vadd.f32 %v2477_v17, %v2273_v35  ;;  %v2790_v1 = vpop.f32.mrf.mxu0  ;;  %v1964_v39 = vadd.f32 %v1860_v59, %v4324_v20  ;;  %v2950_v20 = vld [vmem:[%s5033_s2 + $0xb0] sm:$0xff]  ;;  %v2637_v35 = vld [vmem:[%s4017_s20 + $0xbe] sm:$0xff] }
 0x211   : > { %v2893_v61 = vadd.f32 %v2787_v23, %v2583_v37  ;;  %3664 = vmatmul.msk.f32.gmra.mxu1 %vm284_vm1, %v2014_v45  ;;  %3702 = vmatmul.msk.f32.gmra.mxu2 %vm284_vm1, %v4734_v7  ;;  %v3223_v45 = vmul.f32 %v3144_v46, %v2892_v36  ;;  %v2977_v23 = vpop.permute.xlu1 %2976  ;;  %v2945_v36 = vld [vmem:[%s5033_s2 + $0x88] sm:$0xff] }
 0x212   : > { %3740 = vmatmul.msk.f32.gmra.mxu3 %vm284_vm1, %v2326_v53  ;;  %3778 = vmatmul.msk.f32.gmra.mxu0 %vm284_vm1, %v2636_v0  ;;  %v2952_v53 = vld [vmem:[%s5033_s2 + $0xc0] sm:$0xff] }
 0x213   : > { %3305 = vst [vmem:[%s4725_s27 + $0x8] sm:$0xff] %v2893_v61  ;;  %v3145_v24 = vmul.f32 %v2972_v63, %v2893_v61  ;;  %3076 = vperm.xlu1 %3846, %v2950_v20   ;;  %3051 = vperm.xlu2 %3847, %v2945_v36  }
 0x214   : > { %v2170_v2 = vpop.f32.mrf.mxu2  ;;  %3086 = vperm.xlu0 %3845, %v2952_v53   ;;  %v2948_v53 = vld [vmem:[%s5033_s2 + $0xa0] sm:$0xff] }
 0x215   : > { %v3180_v44 = vadd.f32 %v3145_v24, %v3144_v46  ;;  %v3224_v11 = vmul.f32 %v3145_v24, %v2893_v61  ;;  %v2274_v10 = vadd.f32 %v2170_v2, %v1964_v39  ;;  %v2480_v22 = vpop.f32.mrf.mxu3  ;;  %v4773_v61 = vld [vmem:[%s4017_s20 + $0xc4] sm:$0xff] }
 0x216   : > { %v1863_v27 = vpop.f32.mrf.mxu1  ;;  %v2328_v2 = vld [vmem:[%s4017_s20 + $0xc5] sm:$0xff] }
 0x217   : > { %v3259_v31 = vadd.f32 %v3224_v11, %v3223_v45  ;;  %v2584_v42 = vadd.f32 %v2480_v22, %v2274_v10  ;;  %v2793_v51 = vpop.f32.mrf.mxu0  ;;  %v1965_v59 = vadd.f32 %v1863_v27, %v4334_v43  ;;  %v2953_v43 = vld [vmem:[%s5033_s2 + $0xc8] sm:$0xff] }
 0x218   : > { %v2638_v45 = vld [vmem:[%s4017_s20 + $0xc6] sm:$0xff] }
 0x219   : > { %v2894_v17 = vadd.f32 %v2790_v1, %v2584_v42  ;;  %3665 = vmatmul.msk.f32.gmra.mxu1 %vm284_vm1, %v2015_v52  ;;  %3703 = vmatmul.msk.f32.gmra.mxu2 %vm284_vm1, %v4752_v4  ;;  %v2982_v11 = vpop.permute.xlu1 %2981 }
 0x21a   : > { %3741 = vmatmul.msk.f32.gmra.mxu3 %vm284_vm1, %v2327_v19  ;;  %3779 = vmatmul.msk.f32.gmra.mxu0 %vm284_vm1, %v2637_v35  ;;  %v2987_v35 = vpop.permute.xlu2 %2986 }
 0x21b   : > { %3306 = vst [vmem:[%s4725_s27 + $0x10] sm:$0xff] %v2894_v17  ;;  %v3146_v38 = vmul.f32 %v2977_v23, %v2894_v17  ;;  %3091 = vperm.xlu1 %3846, %v2953_v43   ;;  %v2955_v23 = vld [vmem:[%s5033_s2 + $0xd8] sm:$0xff]  ;;  %3066 = vperm.xlu2 %3847, %v2948_v53  }
 0x21c   : > { %v2173_v37 = vpop.f32.mrf.mxu2  ;;  %3101 = vperm.xlu0 %3845, %v2955_v23   ;;  %v2331_v53 = vld [vmem:[%s4017_s20 + $0xdd] sm:$0xff] }
 0x21d   : > { %v3181_v1 = vadd.f32 %v3180_v44, %v3146_v38  ;;  %v3225_v52 = vmul.f32 %v3146_v38, %v2894_v17  ;;  %v2275_v0 = vadd.f32 %v2173_v37, %v1965_v59  ;;  %v2483_v63 = vpop.f32.mrf.mxu3  ;;  %v2329_v59 = vld [vmem:[%s4017_s20 + $0xcd] sm:$0xff] }
 0x21e   : > { %v1866_v46 = vpop.f32.mrf.mxu1  ;;  %v2639_v37 = vld [vmem:[%s4017_s20 + $0xce] sm:$0xff] }
 0x21f   : > { %v3260_v39 = vadd.f32 %v3259_v31, %v3225_v52  ;;  %v2585_v24 = vadd.f32 %v2483_v63, %v2275_v0  ;;  %v2796_v28 = vpop.f32.mrf.mxu0  ;;  %v1966_v10 = vadd.f32 %v1866_v46, %v4344_v3  ;;  %v2956_v3 = vld [vmem:[%s5033_s2 + $0xe0] sm:$0xff]  ;;  %v2958_v46 = vld [vmem:[%s5033_s2 + $0xf0] sm:$0xff] }
 0x221   : > { %v2895_v44 = vadd.f32 %v2793_v51, %v2585_v24  ;;  %3666 = vmatmul.msk.f32.gmra.mxu1 %vm284_vm1, %v4734_v7  ;;  %3704 = vmatmul.msk.f32.gmra.mxu2 %vm284_vm1, %v4773_v61  ;;  %v4792_v51 = vld [vmem:[%s4017_s20 + $0xcc] sm:$0xff] }
 0x222   : > { %3742 = vmatmul.msk.f32.gmra.mxu3 %vm284_vm1, %v2328_v2  ;;  %3780 = vmatmul.msk.f32.gmra.mxu0 %vm284_vm1, %v2638_v45  ;;  %v2959_v45 = vld [vmem:[%s5033_s2 + $0xf8] sm:$0xff]  ;;  %v2992_v23 = vpop.permute.xlu2 %2991 }
 0x223   : > { %3307 = vst [vmem:[%s4725_s27 + $0x18] sm:$0xff] %v2895_v44  ;;  %v3147_v22 = vmul.f32 %v2982_v11, %v2895_v44  ;;  %3106 = vperm.xlu1 %3846, %v2956_v3  }
 0x224   : > { %v2176_v27 = vpop.f32.mrf.mxu2  ;;  %3116 = vperm.xlu0 %3845, %v2958_v46  }
 0x225   : > { %v3182_v20 = vadd.f32 %v3181_v1, %v3147_v22  ;;  %v3226_v7 = vmul.f32 %v3147_v22, %v2895_v44  ;;  %v2276_v31 = vadd.f32 %v2176_v27, %v1966_v10  ;;  %v2486_v42 = vpop.f32.mrf.mxu3  ;;  %v2330_v44 = vld [vmem:[%s4017_s20 + $0xd5] sm:$0xff] }
 0x226   : > { %v1869_v19 = vpop.f32.mrf.mxu1  ;;  %v2640_v22 = vld [vmem:[%s4017_s20 + $0xd6] sm:$0xff] }
 0x227   : > { %v3261_v36 = vadd.f32 %v3260_v39, %v3226_v7  ;;  %v2586_v17 = vadd.f32 %v2486_v42, %v2276_v31  ;;  %v2799_v38 = vpop.f32.mrf.mxu0  ;;  %v1967_v52 = vadd.f32 %v1869_v19, %v4354_v26  ;;  %v2951_v27 = vld [vmem:[%s5033_s2 + $0xb8] sm:$0xff]  ;;  %v2961_v19 = vld [vmem:[%s5033_s2 + $0x108] sm:$0xff] }
 0x228   : > { %3081 = vperm.xlu2 %3847, %v2951_v27  }
 0x229   : > { %v2896_v1 = vadd.f32 %v2796_v28, %v2586_v17  ;;  %3667 = vmatmul.msk.f32.gmra.mxu1 %vm284_vm1, %v4752_v4  ;;  %3705 = vmatmul.msk.f32.gmra.mxu2 %vm284_vm1, %v4792_v51  ;;  %v2020_v28 = vld [vmem:[%s4017_s20 + $0xd4] sm:$0xff] }
 0x22a   : > { %3743 = vmatmul.msk.f32.gmra.mxu3 %vm284_vm1, %v2329_v59  ;;  %3781 = vmatmul.msk.f32.gmra.mxu0 %vm284_vm1, %v2639_v37  ;;  %v2021_v59 = vld [vmem:[%s4017_s20 + $0xdc] sm:$0xff] }
 0x22b   : > { %3308 = vst [vmem:[%s4725_s27 + $0x20] sm:$0xff] %v2896_v1  ;;  %v3148_v0 = vmul.f32 %v2987_v35, %v2896_v1  ;;  %3121 = vperm.xlu1 %3846, %v2959_v45  }
 0x22c   : > { %v2179_v63 = vpop.f32.mrf.mxu2  ;;  %3131 = vperm.xlu0 %3845, %v2961_v19  }
 0x22d   : > { %v3183_v43 = vadd.f32 %v3182_v20, %v3148_v0  ;;  %v3227_v4 = vmul.f32 %v3148_v0, %v2896_v1  ;;  %v2277_v39 = vadd.f32 %v2179_v63, %v1967_v52  ;;  %v2489_v24 = vpop.f32.mrf.mxu3  ;;  %v2641_v52 = vld [vmem:[%s4017_s20 + $0xde] sm:$0xff]  ;;  %v2954_v0 = vld [vmem:[%s5033_s2 + $0xd0] sm:$0xff]  ;;  %v2997_v63 = vpop.permute.xlu0 %2996 }
 0x22e   : > { %v1872_v2 = vpop.f32.mrf.mxu1 }
 0x22f   : > { %v3262_v26 = vadd.f32 %v3261_v36, %v3227_v4  ;;  %v2587_v11 = vadd.f32 %v2489_v24, %v2277_v39  ;;  %v2802_v10 = vpop.f32.mrf.mxu0  ;;  %v1968_v7 = vadd.f32 %v1872_v2, %v4364_v48 }
 0x230   : > { %3096 = vperm.xlu2 %3847, %v2954_v0  }
 0x231   : > { %v2897_v20 = vadd.f32 %v2799_v38, %v2587_v11  ;;  %3668 = vmatmul.msk.f32.gmra.mxu1 %vm284_vm1, %v4773_v61  ;;  %3706 = vmatmul.msk.f32.gmra.mxu2 %vm284_vm1, %v2020_v28  ;;  %v2962_v38 = vld [vmem:[%s5033_s2 + $0x110] sm:$0xff] }
 0x232   : > { %3744 = vmatmul.msk.f32.gmra.mxu3 %vm284_vm1, %v2330_v44  ;;  %3782 = vmatmul.msk.f32.gmra.mxu0 %vm284_vm1, %v2640_v22  ;;  %v2332_v22 = vld [vmem:[%s4017_s20 + $0xe5] sm:$0xff] }
 0x233   : > { %3309 = vst [vmem:[%s4725_s27 + $0x28] sm:$0xff] %v2897_v20  ;;  %v3149_v31 = vmul.f32 %v2992_v23, %v2897_v20  ;;  %3136 = vperm.xlu1 %3846, %v2962_v38   ;;  %v2642_v23 = vld [vmem:[%s4017_s20 + $0xe6] sm:$0xff] }
 0x234   : > { %v2182_v42 = vpop.f32.mrf.mxu2 }
 0x235   : > { %v3184_v35 = vadd.f32 %v3183_v43, %v3149_v31  ;;  %v3228_v3 = vmul.f32 %v3149_v31, %v2897_v20  ;;  %v2278_v61 = vadd.f32 %v2182_v42, %v1968_v7  ;;  %v2492_v36 = vpop.f32.mrf.mxu3  ;;  %v2957_v20 = vld [vmem:[%s5033_s2 + $0xe8] sm:$0xff] }
 0x236   : > { %v1875_v17 = vpop.f32.mrf.mxu1 }
 0x237   : > { %v3263_v48 = vadd.f32 %v3262_v26, %v3228_v3  ;;  %v2588_v37 = vadd.f32 %v2492_v36, %v2278_v61  ;;  %v2805_v1 = vpop.f32.mrf.mxu0  ;;  %v1969_v43 = vadd.f32 %v1875_v17, %v4374_v8  ;;  %v3002_v8 = vpop.permute.xlu1 %3001 }
 0x238   : > { %3111 = vperm.xlu2 %3847, %v2957_v20  }
 0x239   : > { %v2898_v46 = vadd.f32 %v2802_v10, %v2588_v37  ;;  %3669 = vmatmul.msk.f32.gmra.mxu1 %vm284_vm1, %v4792_v51  ;;  %3707 = vmatmul.msk.f32.gmra.mxu2 %vm284_vm1, %v2021_v59  ;;  %v2022_v51 = vld [vmem:[%s4017_s20 + $0xe4] sm:$0xff]  ;;  %v2333_v37 = vld [vmem:[%s4017_s20 + $0xed] sm:$0xff] }
 0x23a   : > { %3745 = vmatmul.msk.f32.gmra.mxu3 %vm284_vm1, %v2331_v53  ;;  %3783 = vmatmul.msk.f32.gmra.mxu0 %vm284_vm1, %v2641_v52  ;;  %v2960_v52 = vld [vmem:[%s5033_s2 + $0x100] sm:$0xff] }
 0x23b   : > { %3310 = vst [vmem:[%s4725_s27 + $0x30] sm:$0xff] %v2898_v46  ;;  %v3150_v4 = vmul.f32 %v2997_v63, %v2898_v46 }
 0x23c   : > { %v2185_v39 = vpop.f32.mrf.mxu2 }
 0x23d   : > { %v3185_v24 = vadd.f32 %v3184_v35, %v3150_v4  ;;  %v3229_v2 = vmul.f32 %v3150_v4, %v2898_v46  ;;  %v2279_v45 = vadd.f32 %v2185_v39, %v1969_v43  ;;  %v2495_v26 = vpop.f32.mrf.mxu3 }
 0x23e   : > { %v1878_v11 = vpop.f32.mrf.mxu1 }
 0x23f   : > { %v3264_v44 = vadd.f32 %v3263_v48, %v3229_v2  ;;  %v2589_v10 = vadd.f32 %v2495_v26, %v2279_v45  ;;  %v2808_v27 = vpop.f32.mrf.mxu0  ;;  %v1970_v31 = vadd.f32 %v1878_v11, %v4384_v33  ;;  %v3007_v33 = vpop.permute.xlu2 %3006 }
 0x240   : > { %3126 = vperm.xlu2 %3847, %v2960_v52  }
 0x241   : > { %v2899_v7 = vadd.f32 %v2805_v1, %v2589_v10  ;;  %3670 = vmatmul.msk.f32.gmra.mxu1 %vm284_vm1, %v2020_v28  ;;  %3708 = vmatmul.msk.f32.gmra.mxu2 %vm284_vm1, %v2022_v51  ;;  %v2023_v28 = vld [vmem:[%s4017_s20 + $0xec] sm:$0xff] }
 0x242   : > { %3746 = vmatmul.msk.f32.gmra.mxu3 %vm284_vm1, %v2332_v22  ;;  %3784 = vmatmul.msk.f32.gmra.mxu0 %vm284_vm1, %v2642_v23  ;;  %v2643_v1 = vld [vmem:[%s4017_s20 + $0xee] sm:$0xff]  ;;  %v2644_v22 = vld [vmem:[%s4017_s20 + $0xf6] sm:$0xff] }
 0x243   : > { %3311 = vst [vmem:[%s4725_s27 + $0x38] sm:$0xff] %v2899_v7  ;;  %v3151_v42 = vmul.f32 %v3002_v8, %v2899_v7 }
 0x244   : > { %v2188_v19 = vpop.f32.mrf.mxu2 }
 0x245   : > { %v3186_v35 = vadd.f32 %v3185_v24, %v3151_v42  ;;  %v3230_v3 = vmul.f32 %v3151_v42, %v2899_v7  ;;  %v2280_v61 = vadd.f32 %v2188_v19, %v1970_v31  ;;  %v2498_v36 = vpop.f32.mrf.mxu3 }
 0x246   : > { %v1881_v17 = vpop.f32.mrf.mxu1 }
 0x247   : > { %v3265_v38 = vadd.f32 %v3264_v44, %v3230_v3  ;;  %v2590_v48 = vadd.f32 %v2498_v36, %v2280_v61  ;;  %v2811_v53 = vpop.f32.mrf.mxu0  ;;  %v1971_v63 = vadd.f32 %v1881_v17, %v4394_v55  ;;  %v2334_v44 = vld [vmem:[%s4017_s20 + $0xf5] sm:$0xff]  ;;  %v3012_v55 = vpop.permute.xlu0 %3011  ;;  %v2335_v17 = vld [vmem:[%s4017_s20 + $0xfd] sm:$0xff] }
 0x249   : > { %v2900_v0 = vadd.f32 %v2808_v27, %v2590_v48  ;;  %3671 = vmatmul.msk.f32.gmra.mxu1 %vm284_vm1, %v2021_v59  ;;  %3709 = vmatmul.msk.f32.gmra.mxu2 %vm284_vm1, %v2023_v28  ;;  %v2024_v59 = vld [vmem:[%s4017_s20 + $0xf4] sm:$0xff]  ;;  %v2645_v48 = vld [vmem:[%s4017_s20 + $0xfe] sm:$0xff] }
 0x24a   : > { %3747 = vmatmul.msk.f32.gmra.mxu3 %vm284_vm1, %v2333_v37  ;;  %3785 = vmatmul.msk.f32.gmra.mxu0 %vm284_vm1, %v2643_v1  ;;  %v2963_v27 = vld [vmem:[%s5033_s2 + $0x118] sm:$0x3f]  ;;  %v3017_v37 = vpop.permute.xlu1 %3016 }
 0x24b   : > { %3312 = vst [vmem:[%s4725_s27 + $0x40] sm:$0xff] %v2900_v0  ;;  %v3152_v46 = vmul.f32 %v3007_v33, %v2900_v0  ;;  %3141 = vperm.xlu2 %3847, %v2963_v27  }
 0x24c   : > { %v2191_v43 = vpop.f32.mrf.mxu2 }
 0x24d   : > { %v3187_v4 = vadd.f32 %v3186_v35, %v3152_v46  ;;  %v3231_v39 = vmul.f32 %v3152_v46, %v2900_v0  ;;  %v2281_v24 = vadd.f32 %v2191_v43, %v1971_v63  ;;  %v2501_v2 = vpop.f32.mrf.mxu3 }
 0x24e   : > { %v1884_v45 = vpop.f32.mrf.mxu1 }
 0x24f   : > { %v3266_v26 = vadd.f32 %v3265_v38, %v3231_v39  ;;  %v2591_v11 = vadd.f32 %v2501_v2, %v2281_v24  ;;  %v2814_v10 = vpop.f32.mrf.mxu0  ;;  %v1972_v20 = vadd.f32 %v1884_v45, %v4404_v15  ;;  %v2336_v24 = vld [vmem:[%s4017_s20 + $0x105] sm:$0xff] }
 0x250   : > { %v2646_v45 = vld [vmem:[%s4017_s20 + $0x106] sm:$0xff] }
 0x251   : > { %v2901_v23 = vadd.f32 %v2811_v53, %v2591_v11  ;;  %3672 = vmatmul.msk.f32.gmra.mxu1 %vm284_vm1, %v2022_v51  ;;  %3710 = vmatmul.msk.f32.gmra.mxu2 %vm284_vm1, %v2024_v59  ;;  %v2025_v51 = vld [vmem:[%s4017_s20 + $0xfc] sm:$0xff] }
 0x252   : > { %3748 = vmatmul.msk.f32.gmra.mxu3 %vm284_vm1, %v2334_v44  ;;  %3786 = vmatmul.msk.f32.gmra.mxu0 %vm284_vm1, %v2644_v22 }
 0x253   : > { %3313 = vst [vmem:[%s4725_s27 + $0x48] sm:$0xff] %v2901_v23  ;;  %v3153_v8 = vmul.f32 %v3012_v55, %v2901_v23 }
 0x254   : > { %v2194_v7 = vpop.f32.mrf.mxu2 }
 0x255   : > { %v3188_v31 = vadd.f32 %v3187_v4, %v3153_v8  ;;  %v3232_v42 = vmul.f32 %v3153_v8, %v2901_v23  ;;  %v2282_v19 = vadd.f32 %v2194_v7, %v1972_v20  ;;  %v2504_v35 = vpop.f32.mrf.mxu3 }
 0x256   : > { %v1887_v3 = vpop.f32.mrf.mxu1 }
 0x257   : > { %v3267_v61 = vadd.f32 %v3266_v26, %v3232_v42  ;;  %v2592_v36 = vadd.f32 %v2504_v35, %v2282_v19  ;;  %v2817_v38 = vpop.f32.mrf.mxu0  ;;  %v1973_v15 = vadd.f32 %v1887_v3, %v4414_v40  ;;  %v3022_v26 = vpop.permute.xlu2 %3021  ;;  %v2647_v19 = vld [vmem:[%s4017_s20 + $0x10e] sm:$0xff] }
 0x258   : > { %v3027_v35 = vpop.permute.xlu0 %3026 }
 0x259   : > { %v2902_v53 = vadd.f32 %v2814_v10, %v2592_v36  ;;  %3673 = vmatmul.msk.f32.gmra.mxu1 %vm284_vm1, %v2023_v28  ;;  %3711 = vmatmul.msk.f32.gmra.mxu2 %vm284_vm1, %v2025_v51  ;;  %v2026_v28 = vld [vmem:[%s4017_s20 + $0x104] sm:$0xff] }
 0x25a   : > { %3749 = vmatmul.msk.f32.gmra.mxu3 %vm284_vm1, %v2335_v17  ;;  %3787 = vmatmul.msk.f32.gmra.mxu0 %vm284_vm1, %v2645_v48 }
 0x25b   : > { %3314 = vst [vmem:[%s4725_s27 + $0x50] sm:$0xff] %v2902_v53  ;;  %v3154_v1 = vmul.f32 %v3017_v37, %v2902_v53 }
 0x25c   : > { %v2197_v52 = vpop.f32.mrf.mxu2 }
 0x25d   : > { %v3189_v33 = vadd.f32 %v3188_v31, %v3154_v1  ;;  %v3233_v0 = vmul.f32 %v3154_v1, %v2902_v53  ;;  %v2283_v63 = vadd.f32 %v2197_v52, %v1973_v15  ;;  %v2507_v46 = vpop.f32.mrf.mxu3  ;;  %v2337_v31 = vld [vmem:[%s4017_s20 + $0x10d] sm:$0xff]  ;;  %v2338_v52 = vld [vmem:[%s4017_s20 + $0x115] sm:$0xff] }
 0x25e   : > { %v1890_v43 = vpop.f32.mrf.mxu1 }
 0x25f   : > { %v3268_v4 = vadd.f32 %v3267_v61, %v3233_v0  ;;  %v2593_v39 = vadd.f32 %v2507_v46, %v2283_v63  ;;  %v2820_v2 = vpop.f32.mrf.mxu0  ;;  %v1974_v40 = vadd.f32 %v1890_v43, %v4424_v62  ;;  %v2648_v0 = vld [vmem:[%s4017_s20 + $0x116] sm:$0xff]  ;;  %v3032_v63 = vpop.permute.xlu1 %3031 }
 0x261   : > { %v2903_v11 = vadd.f32 %v2817_v38, %v2593_v39  ;;  %3674 = vmatmul.msk.f32.gmra.mxu1 %vm284_vm1, %v2024_v59  ;;  %3712 = vmatmul.msk.f32.gmra.mxu2 %vm284_vm1, %v2026_v28  ;;  %v2027_v59 = vld [vmem:[%s4017_s20 + $0x10c] sm:$0xff] }
 0x262   : > { %3750 = vmatmul.msk.f32.gmra.mxu3 %vm284_vm1, %v2336_v24  ;;  %3788 = vmatmul.msk.f32.gmra.mxu0 %vm284_vm1, %v2646_v45 }
 0x263   : > { %3315 = vst [vmem:[%s4725_s27 + $0x58] sm:$0xff] %v2903_v11  ;;  %v3155_v44 = vmul.f32 %v3022_v26, %v2903_v11 }
 0x264   : > { %v2200_v10 = vpop.f32.mrf.mxu2 }
 0x265   : > { %v3190_v22 = vadd.f32 %v3189_v33, %v3155_v44  ;;  %v3234_v27 = vmul.f32 %v3155_v44, %v2903_v11  ;;  %v2284_v55 = vadd.f32 %v2200_v10, %v1974_v40  ;;  %v2510_v23 = vpop.f32.mrf.mxu3  ;;  %v2339_v44 = vld [vmem:[%s4017_s20 + $0x11d] sm:$0xff] }
 0x266   : > { %v1893_v20 = vpop.f32.mrf.mxu1 }
 0x267   : > { %v3269_v8 = vadd.f32 %v3268_v4, %v3234_v27  ;;  %v2594_v7 = vadd.f32 %v2510_v23, %v2284_v55  ;;  %v2823_v42 = vpop.f32.mrf.mxu0  ;;  %v1975_v62 = vadd.f32 %v1893_v20, %v4434_v6  ;;  %v3037_v27 = vpop.permute.xlu2 %3036 }
 0x269   : > { %v2904_v3 = vadd.f32 %v2820_v2, %v2594_v7  ;;  %3675 = vmatmul.msk.f32.gmra.mxu1 %vm284_vm1, %v2025_v51  ;;  %3713 = vmatmul.msk.f32.gmra.mxu2 %vm284_vm1, %v2027_v59  ;;  %v2028_v51 = vld [vmem:[%s4017_s20 + $0x114] sm:$0xff] }
 0x26a   : > { %3751 = vmatmul.msk.f32.gmra.mxu3 %vm284_vm1, %v2337_v31  ;;  %3789 = vmatmul.msk.f32.gmra.mxu0 %vm284_vm1, %v2647_v19 }
 0x26b   : > { %3316 = vst [vmem:[%s4725_s27 + $0x60] sm:$0xff] %v2904_v3  ;;  %v3156_v61 = vmul.f32 %v3027_v35, %v2904_v3 }
 0x26c   : > { %v2203_v36 = vpop.f32.mrf.mxu2 }
 0x26d   : > { %v3191_v17 = vadd.f32 %v3190_v22, %v3156_v61  ;;  %v3235_v38 = vmul.f32 %v3156_v61, %v2904_v3  ;;  %v2285_v48 = vadd.f32 %v2203_v36, %v1975_v62  ;;  %v2513_v37 = vpop.f32.mrf.mxu3  ;;  %v2649_v22 = vld [vmem:[%s4017_s20 + $0x11e] sm:$0xff]  ;;  %v2650_v36 = vld [vmem:[%s4017_s20 + $0x126] sm:$0xff] }
 0x26e   : > { %v1896_v53 = vpop.f32.mrf.mxu1  ;;  %v2340_v62 = vld [vmem:[%s4017_s20 + $0x125] sm:$0xff] }
 0x26f   : > { %v3270_v15 = vadd.f32 %v3269_v8, %v3235_v38  ;;  %v2595_v1 = vadd.f32 %v2513_v37, %v2285_v48  ;;  %v2826_v33 = vpop.f32.mrf.mxu0  ;;  %v1976_v6 = vadd.f32 %v1896_v53, %v4444_v29 }
 0x271   : > { %v2905_v46 = vadd.f32 %v2823_v42, %v2595_v1  ;;  %3676 = vmatmul.msk.f32.gmra.mxu1 %vm284_vm1, %v2026_v28  ;;  %3714 = vmatmul.msk.f32.gmra.mxu2 %vm284_vm1, %v2028_v51  ;;  %v2029_v28 = vld [vmem:[%s4017_s20 + $0x11c] sm:$0xff] }
 0x272   : > { %3752 = vmatmul.msk.f32.gmra.mxu3 %vm284_vm1, %v2338_v52  ;;  %3790 = vmatmul.msk.f32.gmra.mxu0 %vm284_vm1, %v2648_v0 }
 0x273   : > { %3317 = vst [vmem:[%s4725_s27 + $0x68] sm:$0xff] %v2905_v46  ;;  %v3157_v43 = vmul.f32 %v3032_v63, %v2905_v46 }
 0x274   : > { %v2206_v4 = vpop.f32.mrf.mxu2 }
 0x275   : > { %v3192_v39 = vadd.f32 %v3191_v17, %v3157_v43  ;;  %v3236_v24 = vmul.f32 %v3157_v43, %v2905_v46  ;;  %v2286_v2 = vadd.f32 %v2206_v4, %v1976_v6  ;;  %v2516_v45 = vpop.f32.mrf.mxu3  ;;  %v3042_v17 = vpop.permute.xlu0 %3041  ;;  %v2341_v46 = vld [vmem:[%s4017_s20 + $0x12d] sm:$0xff] }
 0x276   : > { %v1899_v26 = vpop.f32.mrf.mxu1  ;;  %v2651_v43 = vld [vmem:[%s4017_s20 + $0x12e] sm:$0xff]  ;;  %v3047_v4 = vpop.permute.xlu1 %3046 }
 0x277   : > { %v3271_v11 = vadd.f32 %v3270_v15, %v3236_v24  ;;  %v2596_v40 = vadd.f32 %v2516_v45, %v2286_v2  ;;  %v2829_v10 = vpop.f32.mrf.mxu0  ;;  %v1977_v29 = vadd.f32 %v1899_v26, %v4454_v54 }
 0x279   : > { %v2906_v55 = vadd.f32 %v2826_v33, %v2596_v40  ;;  %3677 = vmatmul.msk.f32.gmra.mxu1 %vm284_vm1, %v2027_v59  ;;  %3715 = vmatmul.msk.f32.gmra.mxu2 %vm284_vm1, %v2029_v28  ;;  %v2030_v59 = vld [vmem:[%s4017_s20 + $0x124] sm:$0xff] }
 0x27a   : > { %3753 = vmatmul.msk.f32.gmra.mxu3 %vm284_vm1, %v2339_v44  ;;  %3791 = vmatmul.msk.f32.gmra.mxu0 %vm284_vm1, %v2649_v22 }
 0x27b   : > { %3318 = vst [vmem:[%s4725_s27 + $0x70] sm:$0xff] %v2906_v55  ;;  %v3158_v23 = vmul.f32 %v3037_v27, %v2906_v55  ;;  %v2342_v27 = vld [vmem:[%s4017_s20 + $0x135] sm:$0xff] }
 0x27c   : > { %v2209_v20 = vpop.f32.mrf.mxu2 }
 0x27d   : > { %v3193_v8 = vadd.f32 %v3192_v39, %v3158_v23  ;;  %v3237_v7 = vmul.f32 %v3158_v23, %v2906_v55  ;;  %v2287_v31 = vadd.f32 %v2209_v20, %v1977_v29  ;;  %v2519_v42 = vpop.f32.mrf.mxu3  ;;  %v2652_v29 = vld [vmem:[%s4017_s20 + $0x136] sm:$0xff]  ;;  %v3052_v23 = vpop.permute.xlu2 %3051 }
 0x27e   : > { %v1902_v19 = vpop.f32.mrf.mxu1 }
 0x27f   : > { %v3272_v35 = vadd.f32 %v3271_v11, %v3237_v7  ;;  %v2597_v3 = vadd.f32 %v2519_v42, %v2287_v31  ;;  %v2832_v61 = vpop.f32.mrf.mxu0  ;;  %v1978_v54 = vadd.f32 %v1902_v19, %v4464_v13 }
 0x281   : > { %v2907_v38 = vadd.f32 %v2829_v10, %v2597_v3  ;;  %3678 = vmatmul.msk.f32.gmra.mxu1 %vm284_vm1, %v2028_v51  ;;  %3716 = vmatmul.msk.f32.gmra.mxu2 %vm284_vm1, %v2030_v59  ;;  %v2031_v51 = vld [vmem:[%s4017_s20 + $0x12c] sm:$0xff] }
 0x282   : > { %3754 = vmatmul.msk.f32.gmra.mxu3 %vm284_vm1, %v2340_v62  ;;  %3792 = vmatmul.msk.f32.gmra.mxu0 %vm284_vm1, %v2650_v36  ;;  %v2033_v62 = vld [vmem:[%s4017_s20 + $0x13c] sm:$0x3f] }
 0x283   : > { %3319 = vst [vmem:[%s4725_s27 + $0x78] sm:$0xff] %v2907_v38  ;;  %v3159_v48 = vmul.f32 %v3042_v17, %v2907_v38  ;;  %v2343_v17 = vld [vmem:[%s4017_s20 + $0x13d] sm:$0x3f] }
 0x284   : > { %v2212_v37 = vpop.f32.mrf.mxu2 }
 0x285   : > { %v3194_v53 = vadd.f32 %v3193_v8, %v3159_v48  ;;  %v3238_v15 = vmul.f32 %v3159_v48, %v2907_v38  ;;  %v2288_v1 = vadd.f32 %v2212_v37, %v1978_v54  ;;  %v2522_v52 = vpop.f32.mrf.mxu3  ;;  %v2653_v54 = vld [vmem:[%s4017_s20 + $0x13e] sm:$0x3f]  ;;  %v3057_v48 = vpop.permute.xlu0 %3056 }
 0x286   : > { %v1905_v33 = vpop.f32.mrf.mxu1 }
 0x287   : > { %v3273_v0 = vadd.f32 %v3272_v35, %v3238_v15  ;;  %v2598_v63 = vadd.f32 %v2522_v52, %v2288_v1  ;;  %v2835_v6 = vpop.f32.mrf.mxu0  ;;  %v1979_v13 = vadd.f32 %v1905_v33, %v4474_v18 }
 0x289   : > { %v2908_v39 = vadd.f32 %v2832_v61, %v2598_v63  ;;  %3679 = vmatmul.msk.f32.gmra.mxu1 %vm284_vm1, %v2029_v28  ;;  %3717 = vmatmul.msk.f32.gmra.mxu2 %vm284_vm1, %v2031_v51  ;;  %v2032_v28 = vld [vmem:[%s4017_s20 + $0x134] sm:$0xff] }
 0x28a   : > { %3755 = vmatmul.msk.f32.gmra.mxu3 %vm284_vm1, %v2341_v46  ;;  %3793 = vmatmul.msk.f32.gmra.mxu0 %vm284_vm1, %v2651_v43  ;;  %v3062_v43 = vpop.permute.xlu1 %3061 }
 0x28b   : > { %3320 = vst [vmem:[%s4725_s27 + $0x80] sm:$0xff] %v2908_v39  ;;  %v3160_v24 = vmul.f32 %v3047_v4, %v2908_v39 }
 0x28c   : > { %v2215_v2 = vpop.f32.mrf.mxu2 }
 0x28d   : > { %v3195_v45 = vadd.f32 %v3194_v53, %v3160_v24  ;;  %v3239_v26 = vmul.f32 %v3160_v24, %v2908_v39  ;;  %v2289_v11 = vadd.f32 %v2215_v2, %v1979_v13  ;;  %v2525_v40 = vpop.f32.mrf.mxu3 }
 0x28e   : > { %v1908_v44 = vpop.f32.mrf.mxu1 }
 0x28f   : > { %v3274_v10 = vadd.f32 %v3273_v0, %v3239_v26  ;;  %v2599_v22 = vadd.f32 %v2525_v40, %v2289_v11  ;;  %v2838_v55 = vpop.f32.mrf.mxu0  ;;  %v1980_v18 = vadd.f32 %v1908_v44, %v4488_v9 }
 0x291   : > { %v2909_v20 = vadd.f32 %v2835_v6, %v2599_v22  ;;  %3680 = vmatmul.msk.f32.gmra.mxu1 %vm284_vm1, %v2030_v59  ;;  %3718 = vmatmul.msk.f32.gmra.mxu2 %vm284_vm1, %v2032_v28  ;;  %v1723_v59 = vld [vmem:[%s4017_s20 + $0x12c] sm:$0x3f]  ;;  %v3067_v22 = vpop.permute.xlu2 %3066  ;;  %s196_s20 = sand.u32 1, %s3902_s16  }
 0x292   : > { %3756 = vmatmul.msk.f32.gmra.mxu3 %vm284_vm1, %v2342_v27  ;;  %3794 = vmatmul.msk.f32.gmra.mxu0 %vm284_vm1, %v2652_v29  ;;  %s3452_s7 = sshll.u32 %s196_s20, 1  ;;  %s3346_s19 = scalar_lea.sflag [#allocation3], %s196_s20 }
 0x293   : > { %3321 = vst [vmem:[%s4725_s27 + $0x88] sm:$0xff] %v2909_v20  ;;  %v3161_v8 = vmul.f32 %v3052_v23, %v2909_v20 }
 0x294   : > { %v2218_v7 = vpop.f32.mrf.mxu2 }
 0x295   : > { %v3196_v31 = vadd.f32 %v3195_v45, %v3161_v8  ;;  %v3240_v42 = vmul.f32 %v3161_v8, %v2909_v20  ;;  %v2290_v19 = vadd.f32 %v2218_v7, %v1980_v18  ;;  %v2528_v35 = vpop.f32.mrf.mxu3 }
 0x296   : > { %v1911_v3 = vpop.f32.mrf.mxu1 }
 0x297   : > { %v3275_v61 = vadd.f32 %v3274_v10, %v3240_v42  ;;  %v2600_v36 = vadd.f32 %v2528_v35, %v2290_v19  ;;  %v2841_v38 = vpop.f32.mrf.mxu0  ;;  %v1981_v9 = vadd.f32 %v1911_v3, %v4502_v16  ;;  %v3072_v35 = vpop.permute.xlu0 %3071 }
 0x299   : > { %v2910_v37 = vadd.f32 %v2838_v55, %v2600_v36  ;;  %3681 = vmatmul.msk.f32.gmra.mxu1 %vm284_vm1, %v1723_v59  ;;  %3719 = vmatmul.msk.f32.gmra.mxu2 %vm284_vm1, %v2033_v62 }
 0x29a   : > { %3757 = vmatmul.msk.f32.gmra.mxu3 %vm284_vm1, %v2343_v17  ;;  %3795 = vmatmul.msk.f32.gmra.mxu0 %vm284_vm1, %v2653_v54 }
 0x29b   : > { %3322 = vst [vmem:[%s4725_s27 + $0x90] sm:$0xff] %v2910_v37  ;;  %v3162_v53 = vmul.f32 %v3057_v48, %v2910_v37 }
 0x29c   : > { %v2221_v15 = vpop.f32.mrf.mxu2 }
 0x29d   : > { %v3197_v1 = vadd.f32 %v3196_v31, %v3162_v53  ;;  %v3241_v52 = vmul.f32 %v3162_v53, %v2910_v37  ;;  %v2291_v33 = vadd.f32 %v2221_v15, %v1981_v9  ;;  %v2531_v51 = vpop.f32.mrf.mxu3  ;;  %v3077_v53 = vpop.permute.xlu1 %3076 }
 0x29e   : > { %v1914_v0 = vpop.f32.mrf.mxu1 }
 0x29f   : > { %v3276_v63 = vadd.f32 %v3275_v61, %v3241_v52  ;;  %v2601_v46 = vadd.f32 %v2531_v51, %v2291_v33  ;;  %v2844_v6 = vpop.f32.mrf.mxu0  ;;  %v1982_v39 = vadd.f32 %v1914_v0, %v4516_v5 }
 0x2a1   : > { %v2911_v4 = vadd.f32 %v2841_v38, %v2601_v46 }
 0x2a3   : > { %3323 = vst [vmem:[%s4725_s27 + $0x98] sm:$0xff] %v2911_v4  ;;  %v3163_v13 = vmul.f32 %v3062_v43, %v2911_v4 }
 0x2a4   : > { %v2224_v24 = vpop.f32.mrf.mxu2 }
 0x2a5   : > { %v3198_v16 = vadd.f32 %v3197_v1, %v3163_v13  ;;  %v3242_v2 = vmul.f32 %v3163_v13, %v2911_v4  ;;  %v2292_v45 = vadd.f32 %v2224_v24, %v1982_v39  ;;  %v2534_v26 = vpop.f32.mrf.mxu3  ;;  %v3082_v39 = vpop.permute.xlu2 %3081 }
 0x2a6   : > { %v1917_v11 = vpop.f32.mrf.mxu1 }
 0x2a7   : > { %v3277_v40 = vadd.f32 %v3276_v63, %v3242_v2  ;;  %v2602_v44 = vadd.f32 %v2534_v26, %v2292_v45  ;;  %v2847_v28 = vpop.f32.mrf.mxu0  ;;  %v1983_v27 = vadd.f32 %v1917_v11, %v4529_v21 }
 0x2a9   : > { %v2912_v10 = vadd.f32 %v2844_v6, %v2602_v44 }
 0x2ab   : > { %v3164_v55 = vmul.f32 %v3067_v22, %v2912_v10  ;;  %3324 = vst [vmem:[%s4725_s27 + $0xa0] sm:$0xff] %v2912_v10  ;;  %v3087_v22 = vpop.permute.xlu0 %3086 }
 0x2ac   : > { %v2227_v5 = vpop.f32.mrf.mxu2 }
 0x2ad   : > { %v3199_v29 = vadd.f32 %v3198_v16, %v3164_v55  ;;  %v3243_v23 = vmul.f32 %v3164_v55, %v2912_v10  ;;  %v2293_v20 = vadd.f32 %v2227_v5, %v1983_v27  ;;  %v2537_v18 = vpop.f32.mrf.mxu3 }
 0x2ae   : > { %v1920_v8 = vpop.f32.mrf.mxu1 }
 0x2af   : > { %v3278_v7 = vadd.f32 %v3277_v40, %v3243_v23  ;;  %v2603_v31 = vadd.f32 %v2537_v18, %v2293_v20  ;;  %v2850_v42 = vpop.f32.mrf.mxu0  ;;  %v1984_v3 = vadd.f32 %v1920_v8, %v4539_v50 }
 0x2b1   : > { %v2913_v19 = vadd.f32 %v2847_v28, %v2603_v31 }
 0x2b3   : > { %v3165_v59 = vmul.f32 %v3072_v35, %v2913_v19  ;;  %3325 = vst [vmem:[%s4725_s27 + $0xa8] sm:$0xff] %v2913_v19 }
 0x2b4   : > { %v2230_v21 = vpop.f32.mrf.mxu2 }
 0x2b5   : > { %v3200_v62 = vadd.f32 %v3199_v29, %v3165_v59  ;;  %v3244_v61 = vmul.f32 %v3165_v59, %v2913_v19  ;;  %v2294_v36 = vadd.f32 %v2230_v21, %v1984_v3  ;;  %v2540_v17 = vpop.f32.mrf.mxu3  ;;  %v3092_v19 = vpop.permute.xlu1 %3091 }
 0x2b6   : > { %v1923_v38 = vpop.f32.mrf.mxu1 }
 0x2b7   : > { %v3279_v54 = vadd.f32 %v3278_v7, %v3244_v61  ;;  %v2604_v48 = vadd.f32 %v2540_v17, %v2294_v36  ;;  %v2853_v37 = vpop.f32.mrf.mxu0  ;;  %v1985_v15 = vadd.f32 %v1923_v38, %v4549_v25 }
 0x2b9   : > { %v2914_v9 = vadd.f32 %v2850_v42, %v2604_v48 }
 0x2bb   : > { %v3166_v1 = vmul.f32 %v3077_v53, %v2914_v9  ;;  %3326 = vst [vmem:[%s4725_s27 + $0xb0] sm:$0xff] %v2914_v9 }
 0x2bc   : > { %v2233_v50 = vpop.f32.mrf.mxu2 }
 0x2bd   : > { %v3201_v52 = vadd.f32 %v3200_v62, %v3166_v1  ;;  %v3245_v33 = vmul.f32 %v3166_v1, %v2914_v9  ;;  %v2295_v51 = vadd.f32 %v2233_v50, %v1985_v15  ;;  %v2543_v0 = vpop.f32.mrf.mxu3 }
 0x2be   : > { %v1926_v63 = vpop.f32.mrf.mxu1 }
 0x2bf   : > { %v3280_v46 = vadd.f32 %v3279_v54, %v3245_v33  ;;  %v2605_v6 = vadd.f32 %v2543_v0, %v2295_v51  ;;  %v2856_v43 = vpop.f32.mrf.mxu0  ;;  %v1986_v13 = vadd.f32 %v1926_v63, %v4562_v41 }
 0x2c1   : > { %v2915_v4 = vadd.f32 %v2853_v37, %v2605_v6  ;;  %v3097_v37 = vpop.permute.xlu2 %3096  ;;  %v3102_v6 = vpop.permute.xlu0 %3101 }
 0x2c3   : > { %v3167_v24 = vmul.f32 %v3082_v39, %v2915_v4  ;;  %3327 = vst [vmem:[%s4725_s27 + $0xb8] sm:$0xff] %v2915_v4 }
 0x2c4   : > { %v2236_v25 = vpop.f32.mrf.mxu2 }
 0x2c5   : > { %v3202_v16 = vadd.f32 %v3201_v52, %v3167_v24  ;;  %v3246_v2 = vmul.f32 %v3167_v24, %v2915_v4  ;;  %v2296_v45 = vadd.f32 %v2236_v25, %v1986_v13  ;;  %v2546_v26 = vpop.f32.mrf.mxu3 }
 0x2c6   : > { %v1929_v11 = vpop.f32.mrf.mxu1 }
 0x2c7   : > { %v3281_v40 = vadd.f32 %v3280_v46, %v3246_v2  ;;  %v2606_v44 = vadd.f32 %v2546_v26, %v2296_v45  ;;  %v2859_v28 = vpop.f32.mrf.mxu0  ;;  %v1987_v27 = vadd.f32 %v1929_v11, %v4578_v58 }
 0x2c9   : > { %v2916_v10 = vadd.f32 %v2856_v43, %v2606_v44 }
 0x2cb   : > { %v3168_v55 = vmul.f32 %v3087_v22, %v2916_v10  ;;  %3328 = vst [vmem:[%s4725_s27 + $0xc0] sm:$0xff] %v2916_v10 }
 0x2cc   : > { %v2239_v41 = vpop.f32.mrf.mxu2 }
 0x2cd   : > { %v3203_v5 = vadd.f32 %v3202_v16, %v3168_v55  ;;  %v3247_v29 = vmul.f32 %v3168_v55, %v2916_v10  ;;  %v2297_v23 = vadd.f32 %v2239_v41, %v1987_v27  ;;  %v2549_v20 = vpop.f32.mrf.mxu3 }
 0x2ce   : > { %v1932_v18 = vpop.f32.mrf.mxu1 }
 0x2cf   : > { %v3282_v8 = vadd.f32 %v3281_v40, %v3247_v29  ;;  %v2607_v7 = vadd.f32 %v2549_v20, %v2297_v23  ;;  %v2862_v31 = vpop.f32.mrf.mxu0  ;;  %v1988_v35 = vadd.f32 %v1932_v18, %v4591_v30  ;;  %v3107_v40 = vpop.permute.xlu1 %3106 }
 0x2d0   : > { %v3112_v18 = vpop.permute.xlu2 %3111 }
 0x2d1   : > { %v2917_v42 = vadd.f32 %v2859_v28, %v2607_v7 }
 0x2d3   : > { %v3169_v3 = vmul.f32 %v3092_v19, %v2917_v42  ;;  %3329 = vst [vmem:[%s4725_s27 + $0xc8] sm:$0xff] %v2917_v42 }
 0x2d4   : > { %v2242_v58 = vpop.f32.mrf.mxu2 }
 0x2d5   : > { %v3204_v59 = vadd.f32 %v3203_v5, %v3169_v3  ;;  %v3248_v21 = vmul.f32 %v3169_v3, %v2917_v42  ;;  %v2298_v62 = vadd.f32 %v2242_v58, %v1988_v35  ;;  %v2552_v61 = vpop.f32.mrf.mxu3 }
 0x2d6   : > { %v1935_v36 = vpop.f32.mrf.mxu1 }
 0x2d7   : > { %v3283_v17 = vadd.f32 %v3282_v8, %v3248_v21  ;;  %v2608_v38 = vadd.f32 %v2552_v61, %v2298_v62  ;;  %v2865_v54 = vpop.f32.mrf.mxu0  ;;  %v1989_v9 = vadd.f32 %v1935_v36, %v4604_v57  ;;  %v3117_v61 = vpop.permute.xlu0 %3116 }
 0x2d9   : > { %v2918_v48 = vadd.f32 %v2862_v31, %v2608_v38 }
 0x2db   : > { %v3170_v53 = vmul.f32 %v3097_v37, %v2918_v48  ;;  %3330 = vst [vmem:[%s4725_s27 + $0xd0] sm:$0xff] %v2918_v48 }
 0x2dc   : > { %v2245_v30 = vpop.f32.mrf.mxu2 }
 0x2dd   : > { %v3205_v15 = vadd.f32 %v3204_v59, %v3170_v53  ;;  %v3249_v1 = vmul.f32 %v3170_v53, %v2918_v48  ;;  %v2299_v50 = vadd.f32 %v2245_v30, %v1989_v9  ;;  %v2555_v52 = vpop.f32.mrf.mxu3 }
 0x2de   : > { %v1938_v33 = vpop.f32.mrf.mxu1 }
 0x2df   : > { %v3284_v51 = vadd.f32 %v3283_v17, %v3249_v1  ;;  %v2609_v0 = vadd.f32 %v2555_v52, %v2299_v50  ;;  %v2868_v63 = vpop.f32.mrf.mxu0  ;;  %v1990_v43 = vadd.f32 %v1938_v33, %v4617_v32  ;;  %v3122_v50 = vpop.permute.xlu1 %3121 }
 0x2e1   : > { %v2919_v46 = vadd.f32 %v2865_v54, %v2609_v0 }
 0x2e3   : > { %v3171_v4 = vmul.f32 %v3102_v6, %v2919_v46  ;;  %3331 = vst [vmem:[%s4725_s27 + $0xd8] sm:$0xff] %v2919_v46 }
 0x2e4   : > { %v2248_v57 = vpop.f32.mrf.mxu2 }
 0x2e5   : > { %v3206_v39 = vadd.f32 %v3205_v15, %v3171_v4  ;;  %v3250_v13 = vmul.f32 %v3171_v4, %v2919_v46  ;;  %v2300_v24 = vadd.f32 %v2248_v57, %v1990_v43  ;;  %v2558_v25 = vpop.f32.mrf.mxu3 }
 0x2e6   : > { %v1941_v16 = vpop.f32.mrf.mxu1 }
 0x2e7   : > { %v3285_v2 = vadd.f32 %v3284_v51, %v3250_v13  ;;  %v2610_v45 = vadd.f32 %v2558_v25, %v2300_v24  ;;  %v2871_v26 = vpop.f32.mrf.mxu0  ;;  %v1991_v44 = vadd.f32 %v1941_v16, %v4630_v47 }
 0x2e9   : > { %v2920_v11 = vadd.f32 %v2868_v63, %v2610_v45 }
 0x2eb   : > { %v3172_v28 = vmul.f32 %v3107_v40, %v2920_v11  ;;  %3332 = vst [vmem:[%s4725_s27 + $0xe0] sm:$0xff] %v2920_v11 }
 0x2ec   : > { %v2251_v32 = vpop.f32.mrf.mxu2 }
 0x2ed   : > { %v3207_v10 = vadd.f32 %v3206_v39, %v3172_v28  ;;  %v3251_v22 = vmul.f32 %v3172_v28, %v2920_v11  ;;  %v2301_v27 = vadd.f32 %v2251_v32, %v1991_v44  ;;  %v2561_v55 = vpop.f32.mrf.mxu3  ;;  %v3127_v39 = vpop.permute.xlu2 %3126 }
 0x2ee   : > { %v1944_v41 = vpop.f32.mrf.mxu1  ;;  %v3132_v32 = vpop.permute.xlu0 %3131 }
 0x2ef   : > { %v3286_v5 = vadd.f32 %v3285_v2, %v3251_v22  ;;  %v2611_v29 = vadd.f32 %v2561_v55, %v2301_v27  ;;  %v2874_v23 = vpop.f32.mrf.mxu0  ;;  %v1992_v8 = vadd.f32 %v1944_v41, %v4643_v14 }
 0x2f1   : > { %v2921_v20 = vadd.f32 %v2871_v26, %v2611_v29 }
 0x2f3   : > { %v3173_v7 = vmul.f32 %v3112_v18, %v2921_v20  ;;  %3333 = vst [vmem:[%s4725_s27 + $0xe8] sm:$0xff] %v2921_v20 }
 0x2f4   : > { %v2254_v47 = vpop.f32.mrf.mxu2 }
 0x2f5   : > { %v3208_v31 = vadd.f32 %v3207_v10, %v3173_v7  ;;  %v3252_v42 = vmul.f32 %v3173_v7, %v2921_v20  ;;  %v2302_v19 = vadd.f32 %v2254_v47, %v1992_v8  ;;  %v2564_v35 = vpop.f32.mrf.mxu3  ;;  %v3137_v7 = vpop.permute.xlu1 %3136 }
 0x2f6   : > { %v1947_v3 = vpop.f32.mrf.mxu1 }
 0x2f7   : > { %v3287_v58 = vadd.f32 %v3286_v5, %v3252_v42  ;;  %v2612_v59 = vadd.f32 %v2564_v35, %v2302_v19  ;;  %v2877_v21 = vpop.f32.mrf.mxu0  ;;  %v1993_v36 = vadd.f32 %v1947_v3, %v4656_v34 }
 0x2f9   : > { %v2922_v62 = vadd.f32 %v2874_v23, %v2612_v59 }
 0x2fb   : > { %v3174_v17 = vmul.f32 %v3117_v61, %v2922_v62  ;;  %3334 = vst [vmem:[%s4725_s27 + $0xf0] sm:$0xff] %v2922_v62  ;;  %v3142_v61 = vpop.permute.xlu2 %3141 }
 0x2fc   : > { %v2257_v14 = vpop.f32.mrf.mxu2 }
 0x2fd   : > { %v3209_v38 = vadd.f32 %v3208_v31, %v3174_v17  ;;  %v3253_v54 = vmul.f32 %v3174_v17, %v2922_v62  ;;  %v2303_v48 = vadd.f32 %v2257_v14, %v1993_v36  ;;  %v2567_v37 = vpop.f32.mrf.mxu3 }
 0x2fe   : > { %v1950_v9 = vpop.f32.mrf.mxu1 }
 0x2ff   : > { %v3288_v53 = vadd.f32 %v3287_v58, %v3253_v54  ;;  %v2613_v30 = vadd.f32 %v2567_v37, %v2303_v48  ;;  %v2880_v15 = vpop.f32.mrf.mxu0  ;;  %v1994_v52 = vadd.f32 %v1950_v9, %v4669_v49 }
 0x301   : > { %v2923_v1 = vadd.f32 %v2877_v21, %v2613_v30 }
 0x303   : > { %v3175_v33 = vmul.f32 %v3122_v50, %v2923_v1  ;;  %3335 = vst [vmem:[%s4725_s27 + $0xf8] sm:$0xff] %v2923_v1 }
 0x304   : > { %v2260_v34 = vpop.f32.mrf.mxu2 }
 0x305   : > { %v3210_v51 = vadd.f32 %v3209_v38, %v3175_v33  ;;  %v3254_v0 = vmul.f32 %v3175_v33, %v2923_v1  ;;  %v2304_v63 = vadd.f32 %v2260_v34, %v1994_v52  ;;  %v2570_v46 = vpop.f32.mrf.mxu3 }
 0x306   : > { %v1953_v6 = vpop.f32.mrf.mxu1 }
 0x307   : > { %v3289_v43 = vadd.f32 %v3288_v53, %v3254_v0  ;;  %v2614_v4 = vadd.f32 %v2570_v46, %v2304_v63  ;;  %v2883_v13 = vpop.f32.mrf.mxu0  ;;  %v1995_v24 = vadd.f32 %v1953_v6, %v4682_v56 }
 0x309   : > { %v2924_v57 = vadd.f32 %v2880_v15, %v2614_v4 }
 0x30b   : > { %v3176_v25 = vmul.f32 %v3127_v39, %v2924_v57  ;;  %3336 = vst [vmem:[%s4725_s27 + $0x100] sm:$0xff] %v2924_v57 }
 0x30c   : > { %v2263_v49 = vpop.f32.mrf.mxu2 }
 0x30d   : > { %v3211_v16 = vadd.f32 %v3210_v51, %v3176_v25  ;;  %v3255_v2 = vmul.f32 %v3176_v25, %v2924_v57  ;;  %v2305_v45 = vadd.f32 %v2263_v49, %v1995_v24  ;;  %v2573_v26 = vpop.f32.mrf.mxu3 }
 0x30e   : > { %v1956_v11 = vpop.f32.mrf.mxu1 }
 0x30f   : > { %v3290_v40 = vadd.f32 %v3289_v43, %v3255_v2  ;;  %v2615_v44 = vadd.f32 %v2573_v26, %v2305_v45  ;;  %v1996_v10 = vadd.f32 %v1956_v11, %v4695_v60  ;;  %v2886_v55 = vpop.f32.mrf.mxu0 }
 0x311   : > { %v2925_v28 = vadd.f32 %v2883_v13, %v2615_v44 }
 0x313   : > { %v3177_v22 = vmul.f32 %v3132_v32, %v2925_v28  ;;  %3337 = vst [vmem:[%s4725_s27 + $0x108] sm:$0xff] %v2925_v28 }
 0x314   : > { %v2266_v27 = vpop.f32.mrf.mxu2 }
 0x315   : > { %v3212_v56 = vadd.f32 %v3211_v16, %v3177_v22  ;;  %v3256_v41 = vmul.f32 %v3177_v22, %v2925_v28  ;;  %v2306_v5 = vadd.f32 %v2266_v27, %v1996_v10  ;;  %v2576_v29 = vpop.f32.mrf.mxu3 }
 0x316   : > { %v1959_v18 = vpop.f32.mrf.mxu1 }
 0x317   : > { %v3291_v23 = vadd.f32 %v3290_v40, %v3256_v41  ;;  %v2616_v20 = vadd.f32 %v2576_v29, %v2306_v5  ;;  %v1997_v47 = vadd.f32 %v1959_v18, %v4708_v12  ;;  %v2889_v58 = vpop.f32.mrf.mxu0 }
 0x319   : > { %v2926_v8 = vadd.f32 %v2886_v55, %v2616_v20 }
 0x31b   : > { %v3178_v31 = vmul.f32 %v3137_v7, %v2926_v8  ;;  %3338 = vst [vmem:[%s4725_s27 + $0x110] sm:$0xff] %v2926_v8 }
 0x31c   : > { %v2269_v60 = vpop.f32.mrf.mxu2 }
 0x31d   : > { %v3213_v42 = vadd.f32 %v3212_v56, %v3178_v31  ;;  %v3257_v19 = vmul.f32 %v3178_v31, %v2926_v8  ;;  %v2307_v35 = vadd.f32 %v2269_v60, %v1997_v47  ;;  %v2579_v3 = vpop.f32.mrf.mxu3 }
 0x31f   : > { %v3292_v59 = vadd.f32 %v3291_v23, %v3257_v19  ;;  %v2617_v21 = vadd.f32 %v2579_v3, %v2307_v35 }
 0x321   : > { %v2927_v62 = vadd.f32 %v2889_v58, %v2617_v21 }
 0x323   : > { %v3179_v36 = vmul.f32 %v3142_v61, %v2927_v62  ;;  %3339 = vst [vmem:[%s4725_s27 + $0x118] sm:$0x3f] %v2927_v62  ;;  %s198_s27 = scalar_lea.vmem [#allocation2], %s3452_s7 }
 0x324   : > { %s3361_s13 = sshll.u32 %s198_s27, 4  ;;  %s3362_s13 = int_to_ptr.vmem [resolvable:$true] %s3361_s13 }
 0x325   : > { %v3215_v17 = vsel %vm3214_vm2, %v3179_v36, 0.0  ;;  %v3258_v14 = vmul.f32 %v3179_v36, %v2927_v62 }
 0x326   : > { %v3216_v12 = vadd.f32 %v3215_v17, %v3213_v42 }
 0x327   : > { %v3293_v38 = vsel %vm3214_vm2, %v3258_v14, 0.0 }
 0x328   : > { %v3217_v54 = vrot.slane %v3216_v12, 4  ;;  %v3294_v48 = vadd.f32 %v3293_v38, %v3292_v59 }
 0x32a   : > { %v3218_v37 = vadd.f32 %v3217_v54, %v3216_v12  ;;  %v3295_v9 = vrot.slane %v3294_v48, 4 }
 0x32c   : > { %v3219_v53 = vrot.slane %v3218_v37, 2  ;;  %v3296_v30 = vadd.f32 %v3295_v9, %v3294_v48 }
 0x32e   : > { %v3297_v15 = vrot.slane %v3296_v30, 2  ;;  %v3220_v1 = vadd.f32 %v3219_v53, %v3218_v37 }
 0x330   : > { %v3221_v50 = vrot.slane %v3220_v1, 1  ;;  %v3298_v52 = vadd.f32 %v3297_v15, %v3296_v30 }
 0x332   : > { %v3299_v33 = vrot.slane %v3298_v52, 1  ;;  %v3222_v34 = vadd.f32 %v3221_v50, %v3220_v1 }
 0x334   : > { %v3300_v51 = vadd.f32 %v3299_v33, %v3298_v52 }
 0x336   : > { %v3302_v0 = vsel %vm3301_vm3, %v3222_v34, %v3300_v51 }
 0x337   : > { %3303 = vst [vmem:[%s198_s27] sm:$0x3] %v3302_v0 }
 0x338   : > { %3875 = shalt.err (!%p3872_p3)
}
 0x339   : > { %3805 = dma.vmem_to_hbm [thread:$0]  (%p3976_p5), %s3362_s13, 32, %s3364_s14, %s3346_s19  }
 0x33a PF: > { %p3811_p4 = scmp.ge.s32.totalorder %s3910_s18, 2  ;;  %s3383_s6 = sand.u32 1, %s3898_s15  }
 0x33b   : > { %s3384_s20 = scalar_lea.sflag [#allocation3], %s3383_s6 }
 0x33c   : > { %p3808_p7 = pnand %p3811_p4, %p3980_p6 }
 0x33e   : > { %p3809_p8 = pneg %p3808_p7 }
 0x340   : > { %3893 = dma.done.wait (%p3809_p8), %s3384_s20, 32  }
 0x341   : > { %3895 = vsyncadd (%p3809_p8), %s3384_s20, 4294967264  ;;  %p15_p9 = scmp.ge.s32.totalorder %s3963_s21, 4   ;;  %s5038_s15 = smov %s3902_s16 }
 0x342   : > { %s5039_s16 = smov %s3906_s17  ;;  %s5040_s17 = smov %s3974_s24 }
 0x343   : > { %s5041_s18 = smov %s3963_s21  ;;  %17 = sbr.rel (!%p15_p9) target bundleno = 3 (0x3), region = 87 }
 0x348   :  { %3390 = vsyncpa [#allocation3], 1 }
 0x349   :  { %3392 = vsyncpa [#allocation3 + $0x1], 1 }

</bundles_post_ra>
